<compile_context>
chip_gen: v5e
topology: v5e:2x2
jax: 0.10.0
libtpu: 0.0.40
codegen_flags: <defaults>
</compile_context>

<pallas_src>
import jax
import jax.numpy as jnp
from jax.experimental import pallas as pl
from jax.experimental.pallas import tpu as pltpu


def dnf_kernel(x_ref, wand_ref, wor_ref, o_ref):
    """x_ref: (I, TB) batch-on-lanes, wand_ref: (H, I), wor_ref: (O, H), o_ref: (O, TB)."""
    n_in = x_ref.shape[0]
    n_hid = wand_ref.shape[0]

    # Clamp weights into [0, 1] (cheap vs. the TB-wide products; redone per grid step so the
    # steps stay independent -> safe under dimension_semantics=("parallel",)).
    w_and = jnp.clip(wand_ref[...], 0.0, 1.0)                   # (H, I)
    w_or = jnp.clip(wor_ref[...], 0.0, 1.0)                     # (O, H)
    xm1 = x_ref[...] - 1.0                                      # (I, TB)

    # ---- soft AND: and_act = prod_i ( w_and[:, i] * (x[i, :] - 1) + 1 )  -> (H, TB) ----
    #      (w*(x-1) + 1 == w*x + (1-w))
    def and_term(i):
        return w_and[:, i:i + 1] * xm1[i:i + 1, :] + 1.0        # (H,1)*(1,TB) -> (H, TB)

    acc_a = and_term(0)
    acc_b = and_term(1) if n_in > 1 else None
    for i in range(2, n_in, 2):
        acc_a = acc_a * and_term(i)
        if i + 1 < n_in:
            acc_b = acc_b * and_term(i + 1)
    and_act = acc_a if acc_b is None else acc_a * acc_b          # (H, TB)

    # ---- soft OR: out = 1 - prod_h ( 1 - w_or[:, h] * and_act[h, :] )  -> (O, TB) ----
    def or_factor(h):
        return 1.0 - w_or[:, h:h + 1] * and_act[h:h + 1, :]      # (O,1)*(1,TB) -> (O, TB)

    acc_a = or_factor(0)
    acc_b = or_factor(1) if n_hid > 1 else None
    for h in range(2, n_hid, 2):
        acc_a = acc_a * or_factor(h)
        if h + 1 < n_hid:
            acc_b = acc_b * or_factor(h + 1)
    prod = acc_a if acc_b is None else acc_a * acc_b             # (O, TB)

    o_ref[...] = (1.0 - prod).astype(o_ref.dtype)


def dnf_forward(inputs, w_and, w_or, *, batch_tile=None):
    """inputs: (B, I), w_and: (I, H), w_or: (H, O) -> (B, O).  float32 compute."""
    B, I = inputs.shape
    I2, H = w_and.shape
    H2, O = w_or.shape
    assert I == I2 and H == H2

    # Batch tile on the lane axis: multiple of 128.  Default 512; push toward 1024+ on v6e
    # (128 MiB VMEM), keep roughly half of that on v7x (64 MiB VMEM shared by 2 TCs).
    if batch_tile is None:
        batch_tile = min(512, ((B + 127) // 128) * 128)
    tb = max(128, ((batch_tile + 127) // 128) * 128)
    b_pad = ((B + tb - 1) // tb) * tb
    n_tiles = b_pad // tb

    # Lane-dense layout: batch on the 128-wide lane axis (zero padding is benign: x=0 gives
    # finite AND terms (1 - w); padded columns are sliced away below).
    x_t = jnp.pad(inputs.astype(jnp.float32).T, ((0, 0), (0, b_pad - B)))   # (I, B_pad)
    wand_t = w_and.astype(jnp.float32).T                                    # (H, I)
    wor_t = w_or.astype(jnp.float32).T                                      # (O, H)

    out_t = pl.pallas_call(
        dnf_kernel,
        out_shape=jax.ShapeDtypeStruct((O, b_pad), jnp.float32),
        grid_spec=pltpu.PrefetchScalarGridSpec(
            num_scalar_prefetch=0,
            grid=(n_tiles,),
            in_specs=[
                pl.BlockSpec((I, tb), lambda b: (0, b)),   # batch tile of x (pipelined)
                pl.BlockSpec((H, I), lambda b: (0, 0)),    # AND weights, VMEM-resident
                pl.BlockSpec((O, H), lambda b: (0, 0)),    # OR weights, VMEM-resident
            ],
            out_specs=pl.BlockSpec((O, tb), lambda b: (0, b)),
        ),
        compiler_params=pltpu.CompilerParams(
            dimension_semantics=("parallel",)),
    )(x_t, wand_t, wor_t)

    return out_t[:, :B].T                                                   # (B, O)


def dnf_reference(inputs, w_and, w_or):
    """Plain-JAX reference mirroring the PyTorch forward (product t-norm, reduce dim=-2)."""
    w_and = jnp.clip(w_and, 0.0, 1.0)
    w_or = jnp.clip(w_or, 0.0, 1.0)
    and_res = w_and * inputs[:, :, None] + (1.0 - w_and)              # (B, I, H)
    and_act = jnp.prod(and_res, axis=-2)                              # (B, H)
    out = 1.0 - jnp.prod(1.0 - w_or * and_act[:, :, None], axis=-2)   # (B, O)
    return out


if __name__ == "__main__":
    input_size = 16
    hidden_size = 32
    output_size = 8

    key = jax.random.PRNGKey(0)
    k_in, k_wand, k_wor, k_in2 = jax.random.split(key, 4)

    # Deterministic parameter init, matching Tensor(...).uniform_(0.0, 1.0) semantics.
    layer_and_weights = jax.random.uniform(
        k_wand, (input_size, hidden_size), dtype=jnp.float32, minval=0.0, maxval=1.0)
    layer_or_weights = jax.random.uniform(
        k_wor, (hidden_size, output_size), dtype=jnp.float32, minval=0.0, maxval=1.0)

    # Small batch (single tile, padded to 128 lanes).
    batch = 2
    inputs = jax.random.uniform(
        k_in, (batch, input_size), dtype=jnp.float32, minval=0.0, maxval=1.0)
    out = jax.block_until_ready(dnf_forward(inputs, layer_and_weights, layer_or_weights))
    ref = dnf_reference(inputs, layer_and_weights, layer_or_weights)
    assert out.shape == (batch, output_size)
    assert jnp.allclose(out, ref, atol=1e-5, rtol=1e-5), (out, ref)

    # Multi-tile batch (exercises the grid pipeline, resident weights and padding).
    batch2 = 300
    inputs2 = jax.random.uniform(
        k_in2, (batch2, input_size), dtype=jnp.float32, minval=0.0, maxval=1.0)
    out2 = jax.block_until_ready(
        dnf_forward(inputs2, layer_and_weights, layer_or_weights, batch_tile=128))
    ref2 = dnf_reference(inputs2, layer_and_weights, layer_or_weights)
    assert out2.shape == (batch2, output_size)
    assert jnp.allclose(out2, ref2, atol=1e-5, rtol=1e-5)

    print("KERNEL_OK")
</pallas_src>

<mosaic_0001>
module attributes {stable_mosaic.version = 11 : i64} {
  func.func @dnf_kernel(%arg0: i32, %arg1: memref<16x128xf32, #tpu.memory_space<vmem>>, %arg2: memref<32x16xf32, #tpu.memory_space<vmem>>, %arg3: memref<8x32xf32, #tpu.memory_space<vmem>>, %arg4: memref<8x128xf32, #tpu.memory_space<vmem>>) attributes {dimension_semantics = [#tpu.dimension_semantics<parallel>], iteration_bounds = array<i64: 1>, scalar_prefetch = 0 : i64, scratch_operands = 0 : i64, tpu.core_type = #tpu.core_type<tc>, window_params = [{transform_indices = @transform_0, window_bounds = array<i64: 16, 128>}, {pipeline_mode = #tpu.pipeline_mode<synchronous>, transform_indices = @transform_1, window_bounds = array<i64: 32, 16>}, {pipeline_mode = #tpu.pipeline_mode<synchronous>, transform_indices = @transform_2, window_bounds = array<i64: 8, 32>}, {transform_indices = @transform_3, window_bounds = array<i64: 8, 128>}]} {
    %c0 = arith.constant 0 : index
    %c0_0 = arith.constant 0 : index
    %0 = vector.load %arg2[%c0, %c0_0] : memref<32x16xf32, #tpu.memory_space<vmem>>, vector<32x16xf32>
    %cst = arith.constant 0.000000e+00 : f32
    %cst_1 = arith.constant 1.000000e+00 : f32
    %1 = vector.broadcast %cst : f32 to vector<32x16xf32>
    %2 = arith.maximumf %1, %0 : vector<32x16xf32>
    %3 = vector.broadcast %cst_1 : f32 to vector<32x16xf32>
    %4 = arith.minimumf %3, %2 : vector<32x16xf32>
    %c0_2 = arith.constant 0 : index
    %c0_3 = arith.constant 0 : index
    %5 = vector.load %arg3[%c0_2, %c0_3] : memref<8x32xf32, #tpu.memory_space<vmem>>, vector<8x32xf32>
    %cst_4 = arith.constant 0.000000e+00 : f32
    %cst_5 = arith.constant 1.000000e+00 : f32
    %6 = vector.broadcast %cst_4 : f32 to vector<8x32xf32>
    %7 = arith.maximumf %6, %5 : vector<8x32xf32>
    %8 = vector.broadcast %cst_5 : f32 to vector<8x32xf32>
    %9 = arith.minimumf %8, %7 : vector<8x32xf32>
    %c0_6 = arith.constant 0 : index
    %c0_7 = arith.constant 0 : index
    %10 = vector.load %arg1[%c0_6, %c0_7] : memref<16x128xf32, #tpu.memory_space<vmem>>, vector<16x128xf32>
    %cst_8 = arith.constant 1.000000e+00 : f32
    %11 = vector.broadcast %cst_8 : f32 to vector<16x128xf32>
    %12 = arith.subf %10, %11 : vector<16x128xf32>
    %13 = vector.extract_strided_slice %4 {offsets = [0, 0], sizes = [32, 1], strides = [1, 1]} : vector<32x16xf32> to vector<32x1xf32>
    %14 = vector.extract_strided_slice %12 {offsets = [0, 0], sizes = [1, 128], strides = [1, 1]} : vector<16x128xf32> to vector<1x128xf32>
    %15 = vector.broadcast %13 : vector<32x1xf32> to vector<32x128xf32>
    %16 = vector.broadcast %14 : vector<1x128xf32> to vector<32x128xf32>
    %17 = arith.mulf %15, %16 : vector<32x128xf32>
    %cst_9 = arith.constant 1.000000e+00 : f32
    %18 = vector.broadcast %cst_9 : f32 to vector<32x128xf32>
    %19 = arith.addf %17, %18 : vector<32x128xf32>
    %20 = vector.extract_strided_slice %4 {offsets = [0, 1], sizes = [32, 1], strides = [1, 1]} : vector<32x16xf32> to vector<32x1xf32>
    %21 = vector.extract_strided_slice %12 {offsets = [1, 0], sizes = [1, 128], strides = [1, 1]} : vector<16x128xf32> to vector<1x128xf32>
    %22 = vector.broadcast %20 : vector<32x1xf32> to vector<32x128xf32>
    %23 = vector.broadcast %21 : vector<1x128xf32> to vector<32x128xf32>
    %24 = arith.mulf %22, %23 : vector<32x128xf32>
    %cst_10 = arith.constant 1.000000e+00 : f32
    %25 = vector.broadcast %cst_10 : f32 to vector<32x128xf32>
    %26 = arith.addf %24, %25 : vector<32x128xf32>
    %27 = vector.extract_strided_slice %4 {offsets = [0, 2], sizes = [32, 1], strides = [1, 1]} : vector<32x16xf32> to vector<32x1xf32>
    %28 = vector.extract_strided_slice %12 {offsets = [2, 0], sizes = [1, 128], strides = [1, 1]} : vector<16x128xf32> to vector<1x128xf32>
    %29 = vector.broadcast %27 : vector<32x1xf32> to vector<32x128xf32>
    %30 = vector.broadcast %28 : vector<1x128xf32> to vector<32x128xf32>
    %31 = arith.mulf %29, %30 : vector<32x128xf32>
    %cst_11 = arith.constant 1.000000e+00 : f32
    %32 = vector.broadcast %cst_11 : f32 to vector<32x128xf32>
    %33 = arith.addf %31, %32 : vector<32x128xf32>
    %34 = arith.mulf %19, %33 : vector<32x128xf32>
    %35 = vector.extract_strided_slice %4 {offsets = [0, 3], sizes = [32, 1], strides = [1, 1]} : vector<32x16xf32> to vector<32x1xf32>
    %36 = vector.extract_strided_slice %12 {offsets = [3, 0], sizes = [1, 128], strides = [1, 1]} : vector<16x128xf32> to vector<1x128xf32>
    %37 = vector.broadcast %35 : vector<32x1xf32> to vector<32x128xf32>
    %38 = vector.broadcast %36 : vector<1x128xf32> to vector<32x128xf32>
    %39 = arith.mulf %37, %38 : vector<32x128xf32>
    %cst_12 = arith.constant 1.000000e+00 : f32
    %40 = vector.broadcast %cst_12 : f32 to vector<32x128xf32>
    %41 = arith.addf %39, %40 : vector<32x128xf32>
    %42 = arith.mulf %26, %41 : vector<32x128xf32>
    %43 = vector.extract_strided_slice %4 {offsets = [0, 4], sizes = [32, 1], strides = [1, 1]} : vector<32x16xf32> to vector<32x1xf32>
    %44 = vector.extract_strided_slice %12 {offsets = [4, 0], sizes = [1, 128], strides = [1, 1]} : vector<16x128xf32> to vector<1x128xf32>
    %45 = vector.broadcast %43 : vector<32x1xf32> to vector<32x128xf32>
    %46 = vector.broadcast %44 : vector<1x128xf32> to vector<32x128xf32>
    %47 = arith.mulf %45, %46 : vector<32x128xf32>
    %cst_13 = arith.constant 1.000000e+00 : f32
    %48 = vector.broadcast %cst_13 : f32 to vector<32x128xf32>
    %49 = arith.addf %47, %48 : vector<32x128xf32>
    %50 = arith.mulf %34, %49 : vector<32x128xf32>
    %51 = vector.extract_strided_slice %4 {offsets = [0, 5], sizes = [32, 1], strides = [1, 1]} : vector<32x16xf32> to vector<32x1xf32>
    %52 = vector.extract_strided_slice %12 {offsets = [5, 0], sizes = [1, 128], strides = [1, 1]} : vector<16x128xf32> to vector<1x128xf32>
    %53 = vector.broadcast %51 : vector<32x1xf32> to vector<32x128xf32>
    %54 = vector.broadcast %52 : vector<1x128xf32> to vector<32x128xf32>
    %55 = arith.mulf %53, %54 : vector<32x128xf32>
    %cst_14 = arith.constant 1.000000e+00 : f32
    %56 = vector.broadcast %cst_14 : f32 to vector<32x128xf32>
    %57 = arith.addf %55, %56 : vector<32x128xf32>
    %58 = arith.mulf %42, %57 : vector<32x128xf32>
    %59 = vector.extract_strided_slice %4 {offsets = [0, 6], sizes = [32, 1], strides = [1, 1]} : vector<32x16xf32> to vector<32x1xf32>
    %60 = vector.extract_strided_slice %12 {offsets = [6, 0], sizes = [1, 128], strides = [1, 1]} : vector<16x128xf32> to vector<1x128xf32>
    %61 = vector.broadcast %59 : vector<32x1xf32> to vector<32x128xf32>
    %62 = vector.broadcast %60 : vector<1x128xf32> to vector<32x128xf32>
    %63 = arith.mulf %61, %62 : vector<32x128xf32>
    %cst_15 = arith.constant 1.000000e+00 : f32
    %64 = vector.broadcast %cst_15 : f32 to vector<32x128xf32>
    %65 = arith.addf %63, %64 : vector<32x128xf32>
    %66 = arith.mulf %50, %65 : vector<32x128xf32>
    %67 = vector.extract_strided_slice %4 {offsets = [0, 7], sizes = [32, 1], strides = [1, 1]} : vector<32x16xf32> to vector<32x1xf32>
    %68 = vector.extract_strided_slice %12 {offsets = [7, 0], sizes = [1, 128], strides = [1, 1]} : vector<16x128xf32> to vector<1x128xf32>
    %69 = vector.broadcast %67 : vector<32x1xf32> to vector<32x128xf32>
    %70 = vector.broadcast %68 : vector<1x128xf32> to vector<32x128xf32>
    %71 = arith.mulf %69, %70 : vector<32x128xf32>
    %cst_16 = arith.constant 1.000000e+00 : f32
    %72 = vector.broadcast %cst_16 : f32 to vector<32x128xf32>
    %73 = arith.addf %71, %72 : vector<32x128xf32>
    %74 = arith.mulf %58, %73 : vector<32x128xf32>
    %75 = vector.extract_strided_slice %4 {offsets = [0, 8], sizes = [32, 1], strides = [1, 1]} : vector<32x16xf32> to vector<32x1xf32>
    %76 = vector.extract_strided_slice %12 {offsets = [8, 0], sizes = [1, 128], strides = [1, 1]} : vector<16x128xf32> to vector<1x128xf32>
    %77 = vector.broadcast %75 : vector<32x1xf32> to vector<32x128xf32>
    %78 = vector.broadcast %76 : vector<1x128xf32> to vector<32x128xf32>
    %79 = arith.mulf %77, %78 : vector<32x128xf32>
    %cst_17 = arith.constant 1.000000e+00 : f32
    %80 = vector.broadcast %cst_17 : f32 to vector<32x128xf32>
    %81 = arith.addf %79, %80 : vector<32x128xf32>
    %82 = arith.mulf %66, %81 : vector<32x128xf32>
    %83 = vector.extract_strided_slice %4 {offsets = [0, 9], sizes = [32, 1], strides = [1, 1]} : vector<32x16xf32> to vector<32x1xf32>
    %84 = vector.extract_strided_slice %12 {offsets = [9, 0], sizes = [1, 128], strides = [1, 1]} : vector<16x128xf32> to vector<1x128xf32>
    %85 = vector.broadcast %83 : vector<32x1xf32> to vector<32x128xf32>
    %86 = vector.broadcast %84 : vector<1x128xf32> to vector<32x128xf32>
    %87 = arith.mulf %85, %86 : vector<32x128xf32>
    %cst_18 = arith.constant 1.000000e+00 : f32
    %88 = vector.broadcast %cst_18 : f32 to vector<32x128xf32>
    %89 = arith.addf %87, %88 : vector<32x128xf32>
    %90 = arith.mulf %74, %89 : vector<32x128xf32>
    %91 = vector.extract_strided_slice %4 {offsets = [0, 10], sizes = [32, 1], strides = [1, 1]} : vector<32x16xf32> to vector<32x1xf32>
    %92 = vector.extract_strided_slice %12 {offsets = [10, 0], sizes = [1, 128], strides = [1, 1]} : vector<16x128xf32> to vector<1x128xf32>
    %93 = vector.broadcast %91 : vector<32x1xf32> to vector<32x128xf32>
    %94 = vector.broadcast %92 : vector<1x128xf32> to vector<32x128xf32>
    %95 = arith.mulf %93, %94 : vector<32x128xf32>
    %cst_19 = arith.constant 1.000000e+00 : f32
    %96 = vector.broadcast %cst_19 : f32 to vector<32x128xf32>
    %97 = arith.addf %95, %96 : vector<32x128xf32>
    %98 = arith.mulf %82, %97 : vector<32x128xf32>
    %99 = vector.extract_strided_slice %4 {offsets = [0, 11], sizes = [32, 1], strides = [1, 1]} : vector<32x16xf32> to vector<32x1xf32>
    %100 = vector.extract_strided_slice %12 {offsets = [11, 0], sizes = [1, 128], strides = [1, 1]} : vector<16x128xf32> to vector<1x128xf32>
    %101 = vector.broadcast %99 : vector<32x1xf32> to vector<32x128xf32>
    %102 = vector.broadcast %100 : vector<1x128xf32> to vector<32x128xf32>
    %103 = arith.mulf %101, %102 : vector<32x128xf32>
    %cst_20 = arith.constant 1.000000e+00 : f32
    %104 = vector.broadcast %cst_20 : f32 to vector<32x128xf32>
    %105 = arith.addf %103, %104 : vector<32x128xf32>
    %106 = arith.mulf %90, %105 : vector<32x128xf32>
    %107 = vector.extract_strided_slice %4 {offsets = [0, 12], sizes = [32, 1], strides = [1, 1]} : vector<32x16xf32> to vector<32x1xf32>
    %108 = vector.extract_strided_slice %12 {offsets = [12, 0], sizes = [1, 128], strides = [1, 1]} : vector<16x128xf32> to vector<1x128xf32>
    %109 = vector.broadcast %107 : vector<32x1xf32> to vector<32x128xf32>
    %110 = vector.broadcast %108 : vector<1x128xf32> to vector<32x128xf32>
    %111 = arith.mulf %109, %110 : vector<32x128xf32>
    %cst_21 = arith.constant 1.000000e+00 : f32
    %112 = vector.broadcast %cst_21 : f32 to vector<32x128xf32>
    %113 = arith.addf %111, %112 : vector<32x128xf32>
    %114 = arith.mulf %98, %113 : vector<32x128xf32>
    %115 = vector.extract_strided_slice %4 {offsets = [0, 13], sizes = [32, 1], strides = [1, 1]} : vector<32x16xf32> to vector<32x1xf32>
    %116 = vector.extract_strided_slice %12 {offsets = [13, 0], sizes = [1, 128], strides = [1, 1]} : vector<16x128xf32> to vector<1x128xf32>
    %117 = vector.broadcast %115 : vector<32x1xf32> to vector<32x128xf32>
    %118 = vector.broadcast %116 : vector<1x128xf32> to vector<32x128xf32>
    %119 = arith.mulf %117, %118 : vector<32x128xf32>
    %cst_22 = arith.constant 1.000000e+00 : f32
    %120 = vector.broadcast %cst_22 : f32 to vector<32x128xf32>
    %121 = arith.addf %119, %120 : vector<32x128xf32>
    %122 = arith.mulf %106, %121 : vector<32x128xf32>
    %123 = vector.extract_strided_slice %4 {offsets = [0, 14], sizes = [32, 1], strides = [1, 1]} : vector<32x16xf32> to vector<32x1xf32>
    %124 = vector.extract_strided_slice %12 {offsets = [14, 0], sizes = [1, 128], strides = [1, 1]} : vector<16x128xf32> to vector<1x128xf32>
    %125 = vector.broadcast %123 : vector<32x1xf32> to vector<32x128xf32>
    %126 = vector.broadcast %124 : vector<1x128xf32> to vector<32x128xf32>
    %127 = arith.mulf %125, %126 : vector<32x128xf32>
    %cst_23 = arith.constant 1.000000e+00 : f32
    %128 = vector.broadcast %cst_23 : f32 to vector<32x128xf32>
    %129 = arith.addf %127, %128 : vector<32x128xf32>
    %130 = arith.mulf %114, %129 : vector<32x128xf32>
    %131 = vector.extract_strided_slice %4 {offsets = [0, 15], sizes = [32, 1], strides = [1, 1]} : vector<32x16xf32> to vector<32x1xf32>
    %132 = vector.extract_strided_slice %12 {offsets = [15, 0], sizes = [1, 128], strides = [1, 1]} : vector<16x128xf32> to vector<1x128xf32>
    %133 = vector.broadcast %131 : vector<32x1xf32> to vector<32x128xf32>
    %134 = vector.broadcast %132 : vector<1x128xf32> to vector<32x128xf32>
    %135 = arith.mulf %133, %134 : vector<32x128xf32>
    %cst_24 = arith.constant 1.000000e+00 : f32
    %136 = vector.broadcast %cst_24 : f32 to vector<32x128xf32>
    %137 = arith.addf %135, %136 : vector<32x128xf32>
    %138 = arith.mulf %122, %137 : vector<32x128xf32>
    %139 = arith.mulf %130, %138 : vector<32x128xf32>
    %140 = vector.extract_strided_slice %9 {offsets = [0, 0], sizes = [8, 1], strides = [1, 1]} : vector<8x32xf32> to vector<8x1xf32>
    %141 = vector.extract_strided_slice %139 {offsets = [0, 0], sizes = [1, 128], strides = [1, 1]} : vector<32x128xf32> to vector<1x128xf32>
    %142 = vector.broadcast %140 : vector<8x1xf32> to vector<8x128xf32>
    %143 = vector.broadcast %141 : vector<1x128xf32> to vector<8x128xf32>
    %144 = arith.mulf %142, %143 : vector<8x128xf32>
    %cst_25 = arith.constant 1.000000e+00 : f32
    %145 = vector.broadcast %cst_25 : f32 to vector<8x128xf32>
    %146 = arith.subf %145, %144 : vector<8x128xf32>
    %147 = vector.extract_strided_slice %9 {offsets = [0, 1], sizes = [8, 1], strides = [1, 1]} : vector<8x32xf32> to vector<8x1xf32>
    %148 = vector.extract_strided_slice %139 {offsets = [1, 0], sizes = [1, 128], strides = [1, 1]} : vector<32x128xf32> to vector<1x128xf32>
    %149 = vector.broadcast %147 : vector<8x1xf32> to vector<8x128xf32>
    %150 = vector.broadcast %148 : vector<1x128xf32> to vector<8x128xf32>
    %151 = arith.mulf %149, %150 : vector<8x128xf32>
    %cst_26 = arith.constant 1.000000e+00 : f32
    %152 = vector.broadcast %cst_26 : f32 to vector<8x128xf32>
    %153 = arith.subf %152, %151 : vector<8x128xf32>
    %154 = vector.extract_strided_slice %9 {offsets = [0, 2], sizes = [8, 1], strides = [1, 1]} : vector<8x32xf32> to vector<8x1xf32>
    %155 = vector.extract_strided_slice %139 {offsets = [2, 0], sizes = [1, 128], strides = [1, 1]} : vector<32x128xf32> to vector<1x128xf32>
    %156 = vector.broadcast %154 : vector<8x1xf32> to vector<8x128xf32>
    %157 = vector.broadcast %155 : vector<1x128xf32> to vector<8x128xf32>
    %158 = arith.mulf %156, %157 : vector<8x128xf32>
    %cst_27 = arith.constant 1.000000e+00 : f32
    %159 = vector.broadcast %cst_27 : f32 to vector<8x128xf32>
    %160 = arith.subf %159, %158 : vector<8x128xf32>
    %161 = arith.mulf %146, %160 : vector<8x128xf32>
    %162 = vector.extract_strided_slice %9 {offsets = [0, 3], sizes = [8, 1], strides = [1, 1]} : vector<8x32xf32> to vector<8x1xf32>
    %163 = vector.extract_strided_slice %139 {offsets = [3, 0], sizes = [1, 128], strides = [1, 1]} : vector<32x128xf32> to vector<1x128xf32>
    %164 = vector.broadcast %162 : vector<8x1xf32> to vector<8x128xf32>
    %165 = vector.broadcast %163 : vector<1x128xf32> to vector<8x128xf32>
    %166 = arith.mulf %164, %165 : vector<8x128xf32>
    %cst_28 = arith.constant 1.000000e+00 : f32
    %167 = vector.broadcast %cst_28 : f32 to vector<8x128xf32>
    %168 = arith.subf %167, %166 : vector<8x128xf32>
    %169 = arith.mulf %153, %168 : vector<8x128xf32>
    %170 = vector.extract_strided_slice %9 {offsets = [0, 4], sizes = [8, 1], strides = [1, 1]} : vector<8x32xf32> to vector<8x1xf32>
    %171 = vector.extract_strided_slice %139 {offsets = [4, 0], sizes = [1, 128], strides = [1, 1]} : vector<32x128xf32> to vector<1x128xf32>
    %172 = vector.broadcast %170 : vector<8x1xf32> to vector<8x128xf32>
    %173 = vector.broadcast %171 : vector<1x128xf32> to vector<8x128xf32>
    %174 = arith.mulf %172, %173 : vector<8x128xf32>
    %cst_29 = arith.constant 1.000000e+00 : f32
    %175 = vector.broadcast %cst_29 : f32 to vector<8x128xf32>
    %176 = arith.subf %175, %174 : vector<8x128xf32>
    %177 = arith.mulf %161, %176 : vector<8x128xf32>
    %178 = vector.extract_strided_slice %9 {offsets = [0, 5], sizes = [8, 1], strides = [1, 1]} : vector<8x32xf32> to vector<8x1xf32>
    %179 = vector.extract_strided_slice %139 {offsets = [5, 0], sizes = [1, 128], strides = [1, 1]} : vector<32x128xf32> to vector<1x128xf32>
    %180 = vector.broadcast %178 : vector<8x1xf32> to vector<8x128xf32>
    %181 = vector.broadcast %179 : vector<1x128xf32> to vector<8x128xf32>
    %182 = arith.mulf %180, %181 : vector<8x128xf32>
    %cst_30 = arith.constant 1.000000e+00 : f32
    %183 = vector.broadcast %cst_30 : f32 to vector<8x128xf32>
    %184 = arith.subf %183, %182 : vector<8x128xf32>
    %185 = arith.mulf %169, %184 : vector<8x128xf32>
    %186 = vector.extract_strided_slice %9 {offsets = [0, 6], sizes = [8, 1], strides = [1, 1]} : vector<8x32xf32> to vector<8x1xf32>
    %187 = vector.extract_strided_slice %139 {offsets = [6, 0], sizes = [1, 128], strides = [1, 1]} : vector<32x128xf32> to vector<1x128xf32>
    %188 = vector.broadcast %186 : vector<8x1xf32> to vector<8x128xf32>
    %189 = vector.broadcast %187 : vector<1x128xf32> to vector<8x128xf32>
    %190 = arith.mulf %188, %189 : vector<8x128xf32>
    %cst_31 = arith.constant 1.000000e+00 : f32
    %191 = vector.broadcast %cst_31 : f32 to vector<8x128xf32>
    %192 = arith.subf %191, %190 : vector<8x128xf32>
    %193 = arith.mulf %177, %192 : vector<8x128xf32>
    %194 = vector.extract_strided_slice %9 {offsets = [0, 7], sizes = [8, 1], strides = [1, 1]} : vector<8x32xf32> to vector<8x1xf32>
    %195 = vector.extract_strided_slice %139 {offsets = [7, 0], sizes = [1, 128], strides = [1, 1]} : vector<32x128xf32> to vector<1x128xf32>
    %196 = vector.broadcast %194 : vector<8x1xf32> to vector<8x128xf32>
    %197 = vector.broadcast %195 : vector<1x128xf32> to vector<8x128xf32>
    %198 = arith.mulf %196, %197 : vector<8x128xf32>
    %cst_32 = arith.constant 1.000000e+00 : f32
    %199 = vector.broadcast %cst_32 : f32 to vector<8x128xf32>
    %200 = arith.subf %199, %198 : vector<8x128xf32>
    %201 = arith.mulf %185, %200 : vector<8x128xf32>
    %202 = vector.extract_strided_slice %9 {offsets = [0, 8], sizes = [8, 1], strides = [1, 1]} : vector<8x32xf32> to vector<8x1xf32>
    %203 = vector.extract_strided_slice %139 {offsets = [8, 0], sizes = [1, 128], strides = [1, 1]} : vector<32x128xf32> to vector<1x128xf32>
    %204 = vector.broadcast %202 : vector<8x1xf32> to vector<8x128xf32>
    %205 = vector.broadcast %203 : vector<1x128xf32> to vector<8x128xf32>
    %206 = arith.mulf %204, %205 : vector<8x128xf32>
    %cst_33 = arith.constant 1.000000e+00 : f32
    %207 = vector.broadcast %cst_33 : f32 to vector<8x128xf32>
    %208 = arith.subf %207, %206 : vector<8x128xf32>
    %209 = arith.mulf %193, %208 : vector<8x128xf32>
    %210 = vector.extract_strided_slice %9 {offsets = [0, 9], sizes = [8, 1], strides = [1, 1]} : vector<8x32xf32> to vector<8x1xf32>
    %211 = vector.extract_strided_slice %139 {offsets = [9, 0], sizes = [1, 128], strides = [1, 1]} : vector<32x128xf32> to vector<1x128xf32>
    %212 = vector.broadcast %210 : vector<8x1xf32> to vector<8x128xf32>
    %213 = vector.broadcast %211 : vector<1x128xf32> to vector<8x128xf32>
    %214 = arith.mulf %212, %213 : vector<8x128xf32>
    %cst_34 = arith.constant 1.000000e+00 : f32
    %215 = vector.broadcast %cst_34 : f32 to vector<8x128xf32>
    %216 = arith.subf %215, %214 : vector<8x128xf32>
    %217 = arith.mulf %201, %216 : vector<8x128xf32>
    %218 = vector.extract_strided_slice %9 {offsets = [0, 10], sizes = [8, 1], strides = [1, 1]} : vector<8x32xf32> to vector<8x1xf32>
    %219 = vector.extract_strided_slice %139 {offsets = [10, 0], sizes = [1, 128], strides = [1, 1]} : vector<32x128xf32> to vector<1x128xf32>
    %220 = vector.broadcast %218 : vector<8x1xf32> to vector<8x128xf32>
    %221 = vector.broadcast %219 : vector<1x128xf32> to vector<8x128xf32>
    %222 = arith.mulf %220, %221 : vector<8x128xf32>
    %cst_35 = arith.constant 1.000000e+00 : f32
    %223 = vector.broadcast %cst_35 : f32 to vector<8x128xf32>
    %224 = arith.subf %223, %222 : vector<8x128xf32>
    %225 = arith.mulf %209, %224 : vector<8x128xf32>
    %226 = vector.extract_strided_slice %9 {offsets = [0, 11], sizes = [8, 1], strides = [1, 1]} : vector<8x32xf32> to vector<8x1xf32>
    %227 = vector.extract_strided_slice %139 {offsets = [11, 0], sizes = [1, 128], strides = [1, 1]} : vector<32x128xf32> to vector<1x128xf32>
    %228 = vector.broadcast %226 : vector<8x1xf32> to vector<8x128xf32>
    %229 = vector.broadcast %227 : vector<1x128xf32> to vector<8x128xf32>
    %230 = arith.mulf %228, %229 : vector<8x128xf32>
    %cst_36 = arith.constant 1.000000e+00 : f32
    %231 = vector.broadcast %cst_36 : f32 to vector<8x128xf32>
    %232 = arith.subf %231, %230 : vector<8x128xf32>
    %233 = arith.mulf %217, %232 : vector<8x128xf32>
    %234 = vector.extract_strided_slice %9 {offsets = [0, 12], sizes = [8, 1], strides = [1, 1]} : vector<8x32xf32> to vector<8x1xf32>
    %235 = vector.extract_strided_slice %139 {offsets = [12, 0], sizes = [1, 128], strides = [1, 1]} : vector<32x128xf32> to vector<1x128xf32>
    %236 = vector.broadcast %234 : vector<8x1xf32> to vector<8x128xf32>
    %237 = vector.broadcast %235 : vector<1x128xf32> to vector<8x128xf32>
    %238 = arith.mulf %236, %237 : vector<8x128xf32>
    %cst_37 = arith.constant 1.000000e+00 : f32
    %239 = vector.broadcast %cst_37 : f32 to vector<8x128xf32>
    %240 = arith.subf %239, %238 : vector<8x128xf32>
    %241 = arith.mulf %225, %240 : vector<8x128xf32>
    %242 = vector.extract_strided_slice %9 {offsets = [0, 13], sizes = [8, 1], strides = [1, 1]} : vector<8x32xf32> to vector<8x1xf32>
    %243 = vector.extract_strided_slice %139 {offsets = [13, 0], sizes = [1, 128], strides = [1, 1]} : vector<32x128xf32> to vector<1x128xf32>
    %244 = vector.broadcast %242 : vector<8x1xf32> to vector<8x128xf32>
    %245 = vector.broadcast %243 : vector<1x128xf32> to vector<8x128xf32>
    %246 = arith.mulf %244, %245 : vector<8x128xf32>
    %cst_38 = arith.constant 1.000000e+00 : f32
    %247 = vector.broadcast %cst_38 : f32 to vector<8x128xf32>
    %248 = arith.subf %247, %246 : vector<8x128xf32>
    %249 = arith.mulf %233, %248 : vector<8x128xf32>
    %250 = vector.extract_strided_slice %9 {offsets = [0, 14], sizes = [8, 1], strides = [1, 1]} : vector<8x32xf32> to vector<8x1xf32>
    %251 = vector.extract_strided_slice %139 {offsets = [14, 0], sizes = [1, 128], strides = [1, 1]} : vector<32x128xf32> to vector<1x128xf32>
    %252 = vector.broadcast %250 : vector<8x1xf32> to vector<8x128xf32>
    %253 = vector.broadcast %251 : vector<1x128xf32> to vector<8x128xf32>
    %254 = arith.mulf %252, %253 : vector<8x128xf32>
    %cst_39 = arith.constant 1.000000e+00 : f32
    %255 = vector.broadcast %cst_39 : f32 to vector<8x128xf32>
    %256 = arith.subf %255, %254 : vector<8x128xf32>
    %257 = arith.mulf %241, %256 : vector<8x128xf32>
    %258 = vector.extract_strided_slice %9 {offsets = [0, 15], sizes = [8, 1], strides = [1, 1]} : vector<8x32xf32> to vector<8x1xf32>
    %259 = vector.extract_strided_slice %139 {offsets = [15, 0], sizes = [1, 128], strides = [1, 1]} : vector<32x128xf32> to vector<1x128xf32>
    %260 = vector.broadcast %258 : vector<8x1xf32> to vector<8x128xf32>
    %261 = vector.broadcast %259 : vector<1x128xf32> to vector<8x128xf32>
    %262 = arith.mulf %260, %261 : vector<8x128xf32>
    %cst_40 = arith.constant 1.000000e+00 : f32
    %263 = vector.broadcast %cst_40 : f32 to vector<8x128xf32>
    %264 = arith.subf %263, %262 : vector<8x128xf32>
    %265 = arith.mulf %249, %264 : vector<8x128xf32>
    %266 = vector.extract_strided_slice %9 {offsets = [0, 16], sizes = [8, 1], strides = [1, 1]} : vector<8x32xf32> to vector<8x1xf32>
    %267 = vector.extract_strided_slice %139 {offsets = [16, 0], sizes = [1, 128], strides = [1, 1]} : vector<32x128xf32> to vector<1x128xf32>
    %268 = vector.broadcast %266 : vector<8x1xf32> to vector<8x128xf32>
    %269 = vector.broadcast %267 : vector<1x128xf32> to vector<8x128xf32>
    %270 = arith.mulf %268, %269 : vector<8x128xf32>
    %cst_41 = arith.constant 1.000000e+00 : f32
    %271 = vector.broadcast %cst_41 : f32 to vector<8x128xf32>
    %272 = arith.subf %271, %270 : vector<8x128xf32>
    %273 = arith.mulf %257, %272 : vector<8x128xf32>
    %274 = vector.extract_strided_slice %9 {offsets = [0, 17], sizes = [8, 1], strides = [1, 1]} : vector<8x32xf32> to vector<8x1xf32>
    %275 = vector.extract_strided_slice %139 {offsets = [17, 0], sizes = [1, 128], strides = [1, 1]} : vector<32x128xf32> to vector<1x128xf32>
    %276 = vector.broadcast %274 : vector<8x1xf32> to vector<8x128xf32>
    %277 = vector.broadcast %275 : vector<1x128xf32> to vector<8x128xf32>
    %278 = arith.mulf %276, %277 : vector<8x128xf32>
    %cst_42 = arith.constant 1.000000e+00 : f32
    %279 = vector.broadcast %cst_42 : f32 to vector<8x128xf32>
    %280 = arith.subf %279, %278 : vector<8x128xf32>
    %281 = arith.mulf %265, %280 : vector<8x128xf32>
    %282 = vector.extract_strided_slice %9 {offsets = [0, 18], sizes = [8, 1], strides = [1, 1]} : vector<8x32xf32> to vector<8x1xf32>
    %283 = vector.extract_strided_slice %139 {offsets = [18, 0], sizes = [1, 128], strides = [1, 1]} : vector<32x128xf32> to vector<1x128xf32>
    %284 = vector.broadcast %282 : vector<8x1xf32> to vector<8x128xf32>
    %285 = vector.broadcast %283 : vector<1x128xf32> to vector<8x128xf32>
    %286 = arith.mulf %284, %285 : vector<8x128xf32>
    %cst_43 = arith.constant 1.000000e+00 : f32
    %287 = vector.broadcast %cst_43 : f32 to vector<8x128xf32>
    %288 = arith.subf %287, %286 : vector<8x128xf32>
    %289 = arith.mulf %273, %288 : vector<8x128xf32>
    %290 = vector.extract_strided_slice %9 {offsets = [0, 19], sizes = [8, 1], strides = [1, 1]} : vector<8x32xf32> to vector<8x1xf32>
    %291 = vector.extract_strided_slice %139 {offsets = [19, 0], sizes = [1, 128], strides = [1, 1]} : vector<32x128xf32> to vector<1x128xf32>
    %292 = vector.broadcast %290 : vector<8x1xf32> to vector<8x128xf32>
    %293 = vector.broadcast %291 : vector<1x128xf32> to vector<8x128xf32>
    %294 = arith.mulf %292, %293 : vector<8x128xf32>
    %cst_44 = arith.constant 1.000000e+00 : f32
    %295 = vector.broadcast %cst_44 : f32 to vector<8x128xf32>
    %296 = arith.subf %295, %294 : vector<8x128xf32>
    %297 = arith.mulf %281, %296 : vector<8x128xf32>
    %298 = vector.extract_strided_slice %9 {offsets = [0, 20], sizes = [8, 1], strides = [1, 1]} : vector<8x32xf32> to vector<8x1xf32>
    %299 = vector.extract_strided_slice %139 {offsets = [20, 0], sizes = [1, 128], strides = [1, 1]} : vector<32x128xf32> to vector<1x128xf32>
    %300 = vector.broadcast %298 : vector<8x1xf32> to vector<8x128xf32>
    %301 = vector.broadcast %299 : vector<1x128xf32> to vector<8x128xf32>
    %302 = arith.mulf %300, %301 : vector<8x128xf32>
    %cst_45 = arith.constant 1.000000e+00 : f32
    %303 = vector.broadcast %cst_45 : f32 to vector<8x128xf32>
    %304 = arith.subf %303, %302 : vector<8x128xf32>
    %305 = arith.mulf %289, %304 : vector<8x128xf32>
    %306 = vector.extract_strided_slice %9 {offsets = [0, 21], sizes = [8, 1], strides = [1, 1]} : vector<8x32xf32> to vector<8x1xf32>
    %307 = vector.extract_strided_slice %139 {offsets = [21, 0], sizes = [1, 128], strides = [1, 1]} : vector<32x128xf32> to vector<1x128xf32>
    %308 = vector.broadcast %306 : vector<8x1xf32> to vector<8x128xf32>
    %309 = vector.broadcast %307 : vector<1x128xf32> to vector<8x128xf32>
    %310 = arith.mulf %308, %309 : vector<8x128xf32>
    %cst_46 = arith.constant 1.000000e+00 : f32
    %311 = vector.broadcast %cst_46 : f32 to vector<8x128xf32>
    %312 = arith.subf %311, %310 : vector<8x128xf32>
    %313 = arith.mulf %297, %312 : vector<8x128xf32>
    %314 = vector.extract_strided_slice %9 {offsets = [0, 22], sizes = [8, 1], strides = [1, 1]} : vector<8x32xf32> to vector<8x1xf32>
    %315 = vector.extract_strided_slice %139 {offsets = [22, 0], sizes = [1, 128], strides = [1, 1]} : vector<32x128xf32> to vector<1x128xf32>
    %316 = vector.broadcast %314 : vector<8x1xf32> to vector<8x128xf32>
    %317 = vector.broadcast %315 : vector<1x128xf32> to vector<8x128xf32>
    %318 = arith.mulf %316, %317 : vector<8x128xf32>
    %cst_47 = arith.constant 1.000000e+00 : f32
    %319 = vector.broadcast %cst_47 : f32 to vector<8x128xf32>
    %320 = arith.subf %319, %318 : vector<8x128xf32>
    %321 = arith.mulf %305, %320 : vector<8x128xf32>
    %322 = vector.extract_strided_slice %9 {offsets = [0, 23], sizes = [8, 1], strides = [1, 1]} : vector<8x32xf32> to vector<8x1xf32>
    %323 = vector.extract_strided_slice %139 {offsets = [23, 0], sizes = [1, 128], strides = [1, 1]} : vector<32x128xf32> to vector<1x128xf32>
    %324 = vector.broadcast %322 : vector<8x1xf32> to vector<8x128xf32>
    %325 = vector.broadcast %323 : vector<1x128xf32> to vector<8x128xf32>
    %326 = arith.mulf %324, %325 : vector<8x128xf32>
    %cst_48 = arith.constant 1.000000e+00 : f32
    %327 = vector.broadcast %cst_48 : f32 to vector<8x128xf32>
    %328 = arith.subf %327, %326 : vector<8x128xf32>
    %329 = arith.mulf %313, %328 : vector<8x128xf32>
    %330 = vector.extract_strided_slice %9 {offsets = [0, 24], sizes = [8, 1], strides = [1, 1]} : vector<8x32xf32> to vector<8x1xf32>
    %331 = vector.extract_strided_slice %139 {offsets = [24, 0], sizes = [1, 128], strides = [1, 1]} : vector<32x128xf32> to vector<1x128xf32>
    %332 = vector.broadcast %330 : vector<8x1xf32> to vector<8x128xf32>
    %333 = vector.broadcast %331 : vector<1x128xf32> to vector<8x128xf32>
    %334 = arith.mulf %332, %333 : vector<8x128xf32>
    %cst_49 = arith.constant 1.000000e+00 : f32
    %335 = vector.broadcast %cst_49 : f32 to vector<8x128xf32>
    %336 = arith.subf %335, %334 : vector<8x128xf32>
    %337 = arith.mulf %321, %336 : vector<8x128xf32>
    %338 = vector.extract_strided_slice %9 {offsets = [0, 25], sizes = [8, 1], strides = [1, 1]} : vector<8x32xf32> to vector<8x1xf32>
    %339 = vector.extract_strided_slice %139 {offsets = [25, 0], sizes = [1, 128], strides = [1, 1]} : vector<32x128xf32> to vector<1x128xf32>
    %340 = vector.broadcast %338 : vector<8x1xf32> to vector<8x128xf32>
    %341 = vector.broadcast %339 : vector<1x128xf32> to vector<8x128xf32>
    %342 = arith.mulf %340, %341 : vector<8x128xf32>
    %cst_50 = arith.constant 1.000000e+00 : f32
    %343 = vector.broadcast %cst_50 : f32 to vector<8x128xf32>
    %344 = arith.subf %343, %342 : vector<8x128xf32>
    %345 = arith.mulf %329, %344 : vector<8x128xf32>
    %346 = vector.extract_strided_slice %9 {offsets = [0, 26], sizes = [8, 1], strides = [1, 1]} : vector<8x32xf32> to vector<8x1xf32>
    %347 = vector.extract_strided_slice %139 {offsets = [26, 0], sizes = [1, 128], strides = [1, 1]} : vector<32x128xf32> to vector<1x128xf32>
    %348 = vector.broadcast %346 : vector<8x1xf32> to vector<8x128xf32>
    %349 = vector.broadcast %347 : vector<1x128xf32> to vector<8x128xf32>
    %350 = arith.mulf %348, %349 : vector<8x128xf32>
    %cst_51 = arith.constant 1.000000e+00 : f32
    %351 = vector.broadcast %cst_51 : f32 to vector<8x128xf32>
    %352 = arith.subf %351, %350 : vector<8x128xf32>
    %353 = arith.mulf %337, %352 : vector<8x128xf32>
    %354 = vector.extract_strided_slice %9 {offsets = [0, 27], sizes = [8, 1], strides = [1, 1]} : vector<8x32xf32> to vector<8x1xf32>
    %355 = vector.extract_strided_slice %139 {offsets = [27, 0], sizes = [1, 128], strides = [1, 1]} : vector<32x128xf32> to vector<1x128xf32>
    %356 = vector.broadcast %354 : vector<8x1xf32> to vector<8x128xf32>
    %357 = vector.broadcast %355 : vector<1x128xf32> to vector<8x128xf32>
    %358 = arith.mulf %356, %357 : vector<8x128xf32>
    %cst_52 = arith.constant 1.000000e+00 : f32
    %359 = vector.broadcast %cst_52 : f32 to vector<8x128xf32>
    %360 = arith.subf %359, %358 : vector<8x128xf32>
    %361 = arith.mulf %345, %360 : vector<8x128xf32>
    %362 = vector.extract_strided_slice %9 {offsets = [0, 28], sizes = [8, 1], strides = [1, 1]} : vector<8x32xf32> to vector<8x1xf32>
    %363 = vector.extract_strided_slice %139 {offsets = [28, 0], sizes = [1, 128], strides = [1, 1]} : vector<32x128xf32> to vector<1x128xf32>
    %364 = vector.broadcast %362 : vector<8x1xf32> to vector<8x128xf32>
    %365 = vector.broadcast %363 : vector<1x128xf32> to vector<8x128xf32>
    %366 = arith.mulf %364, %365 : vector<8x128xf32>
    %cst_53 = arith.constant 1.000000e+00 : f32
    %367 = vector.broadcast %cst_53 : f32 to vector<8x128xf32>
    %368 = arith.subf %367, %366 : vector<8x128xf32>
    %369 = arith.mulf %353, %368 : vector<8x128xf32>
    %370 = vector.extract_strided_slice %9 {offsets = [0, 29], sizes = [8, 1], strides = [1, 1]} : vector<8x32xf32> to vector<8x1xf32>
    %371 = vector.extract_strided_slice %139 {offsets = [29, 0], sizes = [1, 128], strides = [1, 1]} : vector<32x128xf32> to vector<1x128xf32>
    %372 = vector.broadcast %370 : vector<8x1xf32> to vector<8x128xf32>
    %373 = vector.broadcast %371 : vector<1x128xf32> to vector<8x128xf32>
    %374 = arith.mulf %372, %373 : vector<8x128xf32>
    %cst_54 = arith.constant 1.000000e+00 : f32
    %375 = vector.broadcast %cst_54 : f32 to vector<8x128xf32>
    %376 = arith.subf %375, %374 : vector<8x128xf32>
    %377 = arith.mulf %361, %376 : vector<8x128xf32>
    %378 = vector.extract_strided_slice %9 {offsets = [0, 30], sizes = [8, 1], strides = [1, 1]} : vector<8x32xf32> to vector<8x1xf32>
    %379 = vector.extract_strided_slice %139 {offsets = [30, 0], sizes = [1, 128], strides = [1, 1]} : vector<32x128xf32> to vector<1x128xf32>
    %380 = vector.broadcast %378 : vector<8x1xf32> to vector<8x128xf32>
    %381 = vector.broadcast %379 : vector<1x128xf32> to vector<8x128xf32>
    %382 = arith.mulf %380, %381 : vector<8x128xf32>
    %cst_55 = arith.constant 1.000000e+00 : f32
    %383 = vector.broadcast %cst_55 : f32 to vector<8x128xf32>
    %384 = arith.subf %383, %382 : vector<8x128xf32>
    %385 = arith.mulf %369, %384 : vector<8x128xf32>
    %386 = vector.extract_strided_slice %9 {offsets = [0, 31], sizes = [8, 1], strides = [1, 1]} : vector<8x32xf32> to vector<8x1xf32>
    %387 = vector.extract_strided_slice %139 {offsets = [31, 0], sizes = [1, 128], strides = [1, 1]} : vector<32x128xf32> to vector<1x128xf32>
    %388 = vector.broadcast %386 : vector<8x1xf32> to vector<8x128xf32>
    %389 = vector.broadcast %387 : vector<1x128xf32> to vector<8x128xf32>
    %390 = arith.mulf %388, %389 : vector<8x128xf32>
    %cst_56 = arith.constant 1.000000e+00 : f32
    %391 = vector.broadcast %cst_56 : f32 to vector<8x128xf32>
    %392 = arith.subf %391, %390 : vector<8x128xf32>
    %393 = arith.mulf %377, %392 : vector<8x128xf32>
    %394 = arith.mulf %385, %393 : vector<8x128xf32>
    %cst_57 = arith.constant 1.000000e+00 : f32
    %395 = vector.broadcast %cst_57 : f32 to vector<8x128xf32>
    %396 = arith.subf %395, %394 : vector<8x128xf32>
    %c0_58 = arith.constant 0 : index
    %c0_59 = arith.constant 0 : index
    %397 = vector.load %arg4[%c0_58, %c0_59] : memref<8x128xf32, #tpu.memory_space<vmem>>, vector<8x128xf32>
    tpu.vector_store %arg4[%c0_58, %c0_59], %396 {strides = array<i32>} : memref<8x128xf32, #tpu.memory_space<vmem>>, vector<8x128xf32>,
    return
  }
  func.func @transform_0(%arg0: i32) -> (i32, i32) {
    %c0_i32 = arith.constant 0 : i32
    %c0_i32_0 = arith.constant 0 : i32
    return %c0_i32, %arg0 : i32, i32
  }
  func.func @transform_1(%arg0: i32) -> (i32, i32) {
    %c0_i32 = arith.constant 0 : i32
    %c0_i32_0 = arith.constant 0 : i32
    %c0_i32_1 = arith.constant 0 : i32
    return %c0_i32, %c0_i32_0 : i32, i32
  }
  func.func @transform_2(%arg0: i32) -> (i32, i32) {
    %c0_i32 = arith.constant 0 : i32
    %c0_i32_0 = arith.constant 0 : i32
    %c0_i32_1 = arith.constant 0 : i32
    return %c0_i32, %c0_i32_0 : i32, i32
  }
  func.func @transform_3(%arg0: i32) -> (i32, i32) {
    %c0_i32 = arith.constant 0 : i32
    %c0_i32_0 = arith.constant 0 : i32
    return %c0_i32, %arg0 : i32, i32
  }
}

</mosaic_0001>

<bundles_post_ra>
// kernel: tpu_custom_call.1
= control target key start
LH: loop header
LB: loop body
LE: loop exit
PB: predicated region body
PF: predicated region fallthrough
CT: control target
= control target key end

     0   :  { %v907_v2 = vmov 1   ;;  %v908_v3 = vmov 0   ;;  %s1351_s0 = inlined_call_operand.vmem [shape: f32[16,128], index: 0, kind: input, shape index: {}]   ;;  %s1352_s1 = inlined_call_operand.vmem [shape: f32[32,16], index: 1, kind: input, shape index: {}]   ;;  %s1353_s2 = inlined_call_operand.vmem [shape: f32[8,32], index: 2, kind: input, shape index: {}]   ;;  %s1354_s3 = inlined_call_operand.hbm [shape: f32[8,128], index: 3, kind: output, shape index: {}]  }
   0x1   :  { %v17_v0 = vld [vmem:[%s1352_s1 + $0x10] sm:$0xff]  ;;  %v15_v1 = vld [vmem:[%s1352_s1] sm:$0xff]  ;;  %809 = vset.pattern.permute.xlu2 %v907_v2  ;;  %808 = vset.pattern.permute.xlu1 %v908_v3  ;;  %v18_v6 = vld [vmem:[%s1352_s1 + $0x18] sm:$0xff] }
   0x2   :  { %v21_v4 = vmax.f32 %v17_v0, 0.0  ;;  %v19_v5 = vmax.f32 %v15_v1, 0.0  ;;  %807 = vset.pattern.permute.xlu0 %v908_v3  ;;  %v16_v7 = vld [vmem:[%s1352_s1 + $0x8] sm:$0xff] }
   0x3   :  { %8 = vsyncpa [#allocation3], 0  ;;  %v22_v10 = vmax.f32 %v18_v6, 0.0  ;;  %v20_v11 = vmax.f32 %v16_v7, 0.0  ;;  %v909_v14 = vmov 2   ;;  %v910_v15 = vmov 4  }
   0x4   :  { %v975_v8 = vmin.f32 %v21_v4, 1.0  ;;  %v977_v9 = vmin.f32 %v19_v5, 1.0  ;;  %v911_v16 = vmov 3   ;;  %v912_v17 = vmov 5   ;;  %v27_v26 = vld [vmem:[%s1353_s2] sm:$0xff]  ;;  %s763_s27 = sshll.u32 %s1354_s3, 4  ;;  %s764_s27 = int_to_ptr.hbm [resolvable:$true] %s763_s27 }
   0x5   :  { %v982_v12 = vmin.f32 %v22_v10, 1.0  ;;  %v984_v13 = vmin.f32 %v20_v11, 1.0  ;;  %v913_v18 = vmov 6   ;;  %v914_v19 = vmov 9   ;;  %v30_v29 = vld [vmem:[%s1351_s0] sm:$0xff] }
   0x6   :  { %46 = vperm.xlu1 %808, %v975_v8   ;;  %64 = vperm.xlu2 %809, %v977_v9   ;;  %v915_v20 = vmov 10   ;;  %v916_v21 = vmov 11   ;;  %v917_v22 = vmov 14   ;;  %v918_v23 = vmov 7  }
   0x7   :  { %36 = vperm.xlu0 %807, %v977_v9   ;;  %v919_v24 = vmov 15   ;;  %v28_v28 = vmax.f32 %v27_v26, 0.0  ;;  %v920_v30 = vmov 8   ;;  %v1054_v32 = vadd.f32 -1.0, %v30_v29 }
   0x8   :  { %v921_v62 = vmov 12  }
   0x9   :  { %v1051_v31 = vmin.f32 %v28_v28, 1.0  ;;  %v1058_v34 = vperm.slane %v1054_v32, 2  ;;  %v1061_v35 = vperm.slane %v1054_v32, 0  ;;  %v1071_v47 = vperm.slane %v1054_v32, 1 }
   0xa   :  { %v1080_v51 = vperm.slane %v1054_v32, 3  ;;  %v1096_v7 = vperm.slane %v1054_v32, 4 }
   0xe   :  { %51 = vperm.xlu1 %808, %v982_v12   ;;  %68 = vperm.xlu2 %809, %v984_v13  }
   0xf   :  { %41 = vperm.xlu0 %807, %v984_v13  }
  0x16   :  { %811 = vset.pattern.permute.xlu1 %v907_v2  ;;  %812 = vset.pattern.permute.xlu2 %v909_v14 }
  0x17   :  { %810 = vset.pattern.permute.xlu0 %v907_v2  ;;  %76 = vperm.xlu1 %811, %v982_v12  }
  0x18   :  { %89 = vperm.xlu2 %812, %v977_v9   ;;  %72 = vperm.xlu0 %810, %v975_v8  }
  0x1f   :  { %813 = vset.pattern.permute.xlu1 %v909_v14 }
  0x20   :  { %97 = vperm.xlu2 %812, %v975_v8   ;;  %816 = vset.pattern.permute.xlu0 %v910_v15 }
  0x21   :  { %93 = vperm.xlu1 %813, %v984_v13   ;;  %147 = vperm.xlu0 %816, %v977_v9  }
  0x28   :  { %815 = vset.pattern.permute.xlu2 %v911_v16 }
  0x29   :  { %814 = vset.pattern.permute.xlu1 %v911_v16  ;;  %122 = vperm.xlu2 %815, %v984_v13  }
  0x2a   :  { %820 = vset.pattern.permute.xlu0 %v912_v17  ;;  %118 = vperm.xlu1 %814, %v977_v9  }
  0x2b   :  { %180 = vperm.xlu0 %820, %v984_v13  }
  0x31   :  { %130 = vperm.xlu2 %815, %v982_v12  }
  0x32   :  { %126 = vperm.xlu1 %814, %v975_v8  }
  0x33   :  { %824 = vset.pattern.permute.xlu0 %v913_v18 }
  0x34   :  { %213 = vperm.xlu0 %824, %v975_v8  }
  0x39   :  { %818 = vset.pattern.permute.xlu2 %v910_v15 }
  0x3a   :  { %817 = vset.pattern.permute.xlu1 %v910_v15  ;;  %155 = vperm.xlu2 %818, %v975_v8  }
  0x3b   :  { %151 = vperm.xlu1 %817, %v984_v13  }
  0x3c   :  { %829 = vset.pattern.permute.xlu0 %v914_v19 }
  0x3d   :  { %292 = vperm.xlu0 %829, %v977_v9  }
  0x42   :  { %819 = vset.pattern.permute.xlu2 %v912_v17 }
  0x43   :  { %159 = vperm.xlu1 %817, %v982_v12   ;;  %176 = vperm.xlu2 %819, %v977_v9  }
  0x45   :  { %833 = vset.pattern.permute.xlu0 %v915_v20 }
  0x46   :  { %325 = vperm.xlu0 %833, %v984_v13  }
  0x4b   :  { %821 = vset.pattern.permute.xlu1 %v912_v17  ;;  %188 = vperm.xlu2 %819, %v982_v12  }
  0x4c   :  { %184 = vperm.xlu1 %821, %v975_v8  }
  0x4e   :  { %837 = vset.pattern.permute.xlu0 %v916_v21 }
  0x4f   :  { %358 = vperm.xlu0 %837, %v975_v8  }
  0x53   :  { %823 = vset.pattern.permute.xlu2 %v913_v18 }
  0x54   :  { %822 = vset.pattern.permute.xlu1 %v913_v18  ;;  %209 = vperm.xlu2 %823, %v984_v13  }
  0x55   :  { %205 = vperm.xlu1 %822, %v977_v9  }
  0x57   :  { %842 = vset.pattern.permute.xlu0 %v917_v22 }
  0x58   :  { %437 = vperm.xlu0 %842, %v977_v9  }
  0x5c   :  { %825 = vset.pattern.permute.xlu2 %v918_v23 }
  0x5d   :  { %217 = vperm.xlu1 %822, %v982_v12   ;;  %234 = vperm.xlu2 %825, %v977_v9  }
  0x60   :  { %846 = vset.pattern.permute.xlu0 %v919_v24  ;;  %v1035_v25 = vpop.permute.xlu2 %64 }
  0x61   :  { %470 = vperm.xlu0 %846, %v984_v13  }
  0x65   :  { %826 = vset.pattern.permute.xlu1 %v918_v23  ;;  %242 = vperm.xlu2 %825, %v975_v8  }
  0x66   :  { %238 = vperm.xlu1 %826, %v984_v13  }
  0x68   :  { %v69_v27 = vpop.permute.xlu2 %68 }
  0x69   :  { %847 = vset.pattern.permute.xlu0 %v909_v14  ;;  %v81_v53 = vmul.f32 %v1071_v47, %v69_v27 }
  0x6a   :  { %101 = vperm.xlu0 %847, %v982_v12  }
  0x6b   :  { %v85_v56 = vadd.f32 1.0, %v81_v53 }
  0x6d   :  { %828 = vset.pattern.permute.xlu2 %v920_v30 }
  0x6e   :  { %827 = vset.pattern.permute.xlu1 %v920_v30  ;;  %267 = vperm.xlu2 %828, %v984_v13  }
  0x6f   :  { %263 = vperm.xlu1 %827, %v977_v9  }
  0x72   :  { %514 = vperm.xlu0 %847, %v1051_v31   ;;  %v90_v33 = vpop.permute.xlu2 %89 }
  0x73   :  { %v105_v36 = vmul.f32 %v1058_v34, %v90_v33 }
  0x75   :  { %v109_v40 = vadd.f32 1.0, %v105_v36 }
  0x76   :  { %275 = vperm.xlu2 %828, %v982_v12  }
  0x77   :  { %271 = vperm.xlu1 %827, %v975_v8  }
  0x78   :  { %v47_v37 = vpop.permute.xlu1 %46 }
  0x79   :  { %v57_v38 = vmul.f32 %v1061_v35, %v47_v37  ;;  %v37_v39 = vpop.permute.xlu0 %36 }
  0x7a   :  { %851 = vset.pattern.permute.xlu0 %v918_v23  ;;  %v98_v41 = vpop.permute.xlu2 %97  ;;  %v55_v42 = vmul.f32 %v1061_v35, %v37_v39 }
  0x7b   :  { %v61_v43 = vadd.f32 1.0, %v57_v38  ;;  %v107_v44 = vmul.f32 %v1058_v34, %v98_v41  ;;  %246 = vperm.xlu0 %851, %v982_v12   ;;  %v80_v41 = vmul.f32 %v1071_v47, %v1035_v25 }
  0x7c   :  { %v59_v45 = vadd.f32 1.0, %v55_v42 }
  0x7d   :  { %v111_v46 = vadd.f32 1.0, %v107_v44 }
  0x7e   :  { %v113_v48 = vmul.f32 %v109_v40, %v59_v45  ;;  %831 = vset.pattern.permute.xlu2 %v914_v19  ;;  %v1110_v40 = vperm.slane %v1054_v32, 5 }
  0x7f   :  { %v115_v49 = vmul.f32 %v111_v46, %v61_v43  ;;  %830 = vset.pattern.permute.xlu1 %v914_v19  ;;  %300 = vperm.xlu2 %831, %v975_v8  }
  0x80   :  { %296 = vperm.xlu1 %830, %v984_v13   ;;  %v1077_v50 = vpop.permute.xlu1 %51 }
  0x81   :  { %v42_v52 = vpop.permute.xlu0 %41 }
  0x82   :  { %v56_v5 = vmul.f32 %v1061_v35, %v42_v52 }
  0x83   :  { %554 = vperm.xlu0 %851, %v1051_v31   ;;  %v123_v54 = vpop.permute.xlu2 %122 }
  0x84   :  { %v135_v55 = vmul.f32 %v1080_v51, %v123_v54  ;;  %v60_v14 = vadd.f32 1.0, %v56_v5 }
  0x86   :  { %v139_v57 = vadd.f32 1.0, %v135_v55 }
  0x87   :  { %832 = vset.pattern.permute.xlu2 %v915_v20 }
  0x88   :  { %v143_v58 = vmul.f32 %v139_v57, %v85_v56  ;;  %304 = vperm.xlu1 %830, %v982_v12   ;;  %321 = vperm.xlu2 %832, %v977_v9  }
  0x89   :  { %v77_v59 = vpop.permute.xlu1 %76 }
  0x8a   :  { %v83_v60 = vmul.f32 %v1071_v47, %v77_v59  ;;  %v73_v61 = vpop.permute.xlu0 %72  ;;  %v1124_v59 = vperm.slane %v1054_v32, 6 }
  0x8b   :  { %856 = vset.pattern.permute.xlu0 %v921_v62  ;;  %v131_v63 = vpop.permute.xlu2 %130  ;;  %v82_v55 = vmul.f32 %v1071_v47, %v73_v61 }
  0x8c   :  { %v87_v0 = vadd.f32 1.0, %v83_v60  ;;  %v137_v1 = vmul.f32 %v1080_v51, %v131_v63  ;;  %391 = vperm.xlu0 %856, %v982_v12  }
  0x8d   :  { %v86_v63 = vadd.f32 1.0, %v82_v55 }
  0x8e   :  { %v141_v4 = vadd.f32 1.0, %v137_v1 }
  0x90   :  { %v145_v6 = vmul.f32 %v141_v4, %v87_v0  ;;  %834 = vset.pattern.permute.xlu1 %v915_v20  ;;  %333 = vperm.xlu2 %832, %v982_v12   ;;  %v922_v4 = vmov 17  }
  0x91   :  { %329 = vperm.xlu1 %834, %v975_v8  }
  0x93   :  { %v94_v10 = vpop.permute.xlu1 %93  ;;  %v148_v11 = vpop.permute.xlu0 %147 }
  0x94   :  { %v106_v23 = vmul.f32 %v1058_v34, %v94_v10  ;;  %v163_v26 = vmul.f32 %v1096_v7, %v148_v11  ;;  %v156_v27 = vpop.permute.xlu2 %155  ;;  %594 = vperm.xlu0 %856, %v1051_v31  }
  0x95   :  { %v165_v28 = vmul.f32 %v1096_v7, %v156_v27 }
  0x96   :  { %v110_v29 = vadd.f32 1.0, %v106_v23  ;;  %v167_v33 = vadd.f32 1.0, %v163_v26  ;;  %v31_v26 = vld [vmem:[%s1351_s0 + $0x8] sm:$0xff]  ;;  %s939_s0 = smov [#allocation2]  }
  0x97   :  { %v169_v36 = vadd.f32 1.0, %v165_v28  ;;  %s761_s24 = sshll.u32 %s939_s0, 4  ;;  %s762_s24 = int_to_ptr.vmem [resolvable:$true] %s761_s24 }
  0x98   :  { %v114_v37 = vmul.f32 %v110_v29, %v60_v14  ;;  %v1103_v38 = vmul.f32 %v167_v33, %v113_v48  ;;  %836 = vset.pattern.permute.xlu2 %v916_v21  ;;  %v1141_v33 = vadd.f32 -1.0, %v31_v26 }
  0x99   :  { %v173_v39 = vmul.f32 %v169_v36, %v115_v49  ;;  %835 = vset.pattern.permute.xlu1 %v916_v21  ;;  %354 = vperm.xlu2 %836, %v984_v13   ;;  %v84_v49 = vadd.f32 1.0, %v80_v41 }
  0x9a   :  { %350 = vperm.xlu1 %835, %v977_v9  }
  0x9c   :  { %v119_v42 = vpop.permute.xlu1 %118  ;;  %865 = vset.pattern.permute.xlu0 %v922_v4 }
  0x9d   :  { %v134_v43 = vmul.f32 %v1080_v51, %v119_v42  ;;  %v181_v44 = vpop.permute.xlu0 %180  ;;  %v177_v45 = vpop.permute.xlu2 %176  ;;  %634 = vperm.xlu0 %865, %v1051_v31  }
  0x9e   :  { %v193_v46 = vmul.f32 %v1110_v40, %v181_v44  ;;  %v192_v48 = vmul.f32 %v1110_v40, %v177_v45  ;;  %v1147_v44 = vperm.slane %v1141_v33, 1 }
  0x9f   :  { %v138_v52 = vadd.f32 1.0, %v134_v43  ;;  %v924_v43 = vmov 13  }
  0xa0   :  { %v197_v53 = vadd.f32 1.0, %v193_v46  ;;  %v196_v54 = vadd.f32 1.0, %v192_v48  ;;  %v1153_v46 = vperm.slane %v1054_v32, 7 }
  0xa1   :  { %v142_v56 = vmul.f32 %v138_v52, %v84_v49  ;;  %838 = vset.pattern.permute.xlu2 %v921_v62  ;;  %v925_v52 = vmov 27  }
  0xa2   :  { %v1119_v57 = vmul.f32 %v197_v53, %v143_v58  ;;  %362 = vperm.xlu1 %835, %v982_v12   ;;  %379 = vperm.xlu2 %838, %v977_v9  }
  0xa3   :  { %v200_v25 = vmul.f32 %v196_v54, %v142_v56 }
  0xa4   :  { %v127_v60 = vpop.permute.xlu1 %126 }
  0xa5   :  { %v136_v0 = vmul.f32 %v1080_v51, %v127_v60  ;;  %v189_v1 = vpop.permute.xlu2 %188 }
  0xa6   :  { %v195_v47 = vmul.f32 %v1110_v40, %v189_v1  ;;  %v214_v61 = vpop.permute.xlu0 %213 }
  0xa7   :  { %v140_v58 = vadd.f32 1.0, %v136_v0  ;;  %v223_v5 = vmul.f32 %v1124_v59, %v214_v61 }
  0xa8   :  { %v199_v10 = vadd.f32 1.0, %v195_v47 }
  0xa9   :  { %v144_v11 = vmul.f32 %v140_v58, %v86_v63  ;;  %v227_v14 = vadd.f32 1.0, %v223_v5  ;;  %v1165_v5 = vperm.slane %v1141_v33, 2 }
  0xaa   :  { %v1130_v23 = vmul.f32 %v199_v10, %v145_v6  ;;  %839 = vset.pattern.permute.xlu1 %v921_v62  ;;  %387 = vperm.xlu2 %838, %v975_v8   ;;  %v923_v6 = vmov 22  }
  0xab   :  { %v1134_v51 = vmul.f32 %v227_v14, %v173_v39  ;;  %383 = vperm.xlu1 %839, %v984_v13   ;;  %870 = vset.pattern.permute.xlu0 %v923_v6 }
  0xac   :  { %674 = vperm.xlu0 %870, %v1051_v31  }
  0xad   :  { %v152_v27 = vpop.permute.xlu1 %151 }
  0xae   :  { %v164_v28 = vmul.f32 %v1096_v7, %v152_v27  ;;  %v210_v29 = vpop.permute.xlu2 %209 }
  0xaf   :  { %v222_v62 = vmul.f32 %v1124_v59, %v210_v29  ;;  %v293_v36 = vpop.permute.xlu0 %292 }
  0xb0   :  { %v168_v39 = vadd.f32 1.0, %v164_v28  ;;  %v308_v49 = vmul.f32 %v1147_v44, %v293_v36 }
  0xb1   :  { %v226_v41 = vadd.f32 1.0, %v222_v62 }
  0xb2   :  { %v172_v42 = vmul.f32 %v168_v39, %v114_v37  ;;  %841 = vset.pattern.permute.xlu2 %v924_v43  ;;  %v312_v55 = vadd.f32 1.0, %v308_v49 }
  0xb3   :  { %840 = vset.pattern.permute.xlu1 %v924_v43  ;;  %412 = vperm.xlu2 %841, %v984_v13  }
  0xb4   :  { %v230_v45 = vmul.f32 %v226_v41, %v172_v42  ;;  %408 = vperm.xlu1 %840, %v977_v9   ;;  %875 = vset.pattern.permute.xlu0 %v925_v52  ;;  %v1188_v52 = vperm.slane %v1141_v33, 3 }
  0xb5   :  { %v160_v48 = vpop.permute.xlu1 %159  ;;  %714 = vperm.xlu0 %875, %v1051_v31  }
  0xb7   :  { %v235_v37 = vpop.permute.xlu2 %234 }
  0xb8   :  { %v250_v53 = vmul.f32 %v1153_v46, %v235_v37  ;;  %v326_v54 = vpop.permute.xlu0 %325 }
  0xb9   :  { %v338_v14 = vmul.f32 %v1165_v5, %v326_v54 }
  0xba   :  { %v254_v56 = vadd.f32 1.0, %v250_v53 }
  0xbb   :  { %420 = vperm.xlu2 %841, %v982_v12   ;;  %v342_v62 = vadd.f32 1.0, %v338_v14 }
  0xbc   :  { %v258_v60 = vmul.f32 %v254_v56, %v200_v25  ;;  %416 = vperm.xlu1 %840, %v975_v8  }
  0xbe   :  { %v185_v32 = vpop.permute.xlu1 %184  ;;  %v1160_v63 = vmul.f32 %v312_v55, %v258_v60  ;;  %v58_v55 = vmul.f32 %v1061_v35, %v1077_v50 }
  0xbf   :  { %v194_v0 = vmul.f32 %v1110_v40, %v185_v32  ;;  %v243_v1 = vpop.permute.xlu2 %242  ;;  %v1172_v40 = vperm.slane %v1141_v33, 0 }
  0xc0   :  { %v252_v4 = vmul.f32 %v1153_v46, %v243_v1  ;;  %v166_v1 = vmul.f32 %v1096_v7, %v160_v48 }
  0xc1   :  { %v198_v47 = vadd.f32 1.0, %v194_v0  ;;  %v359_v61 = vpop.permute.xlu0 %358 }
  0xc2   :  { %v256_v58 = vadd.f32 1.0, %v252_v4 }
  0xc3   :  { %v202_v10 = vmul.f32 %v198_v47, %v144_v11  ;;  %844 = vset.pattern.permute.xlu2 %v917_v22  ;;  %v62_v47 = vadd.f32 1.0, %v58_v55 }
  0xc4   :  { %843 = vset.pattern.permute.xlu1 %v917_v22  ;;  %445 = vperm.xlu2 %844, %v975_v8  }
  0xc5   :  { %v260_v25 = vmul.f32 %v256_v58, %v202_v10  ;;  %441 = vperm.xlu1 %843, %v984_v13  }
  0xc7   :  { %v206_v26 = vpop.permute.xlu1 %205 }
  0xc8   :  { %v221_v27 = vmul.f32 %v1124_v59, %v206_v26  ;;  %v268_v28 = vpop.permute.xlu2 %267 }
  0xc9   :  { %v280_v11 = vmul.f32 %v1172_v40, %v268_v28 }
  0xca   :  { %v225_v29 = vadd.f32 1.0, %v221_v27  ;;  %v1177_v6 = vpop.permute.xlu0 %437 }
  0xcb   :  { %v284_v36 = vadd.f32 1.0, %v280_v11 }
  0xcc   :  { %v229_v39 = vmul.f32 %v225_v29, %v1103_v38  ;;  %845 = vset.pattern.permute.xlu2 %v919_v24  ;;  %v368_v38 = vmul.f32 %v1188_v52, %v359_v61 }
  0xcd   :  { %v288_v13 = vmul.f32 %v284_v36, %v230_v45  ;;  %449 = vperm.xlu1 %843, %v982_v12   ;;  %466 = vperm.xlu2 %845, %v977_v9  }
  0xce   :  { %v372_v60 = vadd.f32 1.0, %v368_v38 }
  0xcf   :  { %v218_v41 = vpop.permute.xlu1 %217  ;;  %v1183_v42 = vmul.f32 %v342_v62, %v288_v13 }
  0xd0   :  { %v276_v49 = vpop.permute.xlu2 %275  ;;  %v224_v35 = vmul.f32 %v1124_v59, %v218_v41 }
  0xd1   :  { %v282_v50 = vmul.f32 %v1172_v40, %v276_v49 }
  0xd2   :  { %v228_v10 = vadd.f32 1.0, %v224_v35 }
  0xd3   :  { %v1185_v37 = vpop.permute.xlu0 %470 }
  0xd5   :  { %848 = vset.pattern.permute.xlu1 %v919_v24  ;;  %478 = vperm.xlu2 %845, %v982_v12  }
  0xd6   :  { %474 = vperm.xlu1 %848, %v975_v8  }
  0xd8   :  { %v239_v45 = vpop.permute.xlu1 %238 }
  0xd9   :  { %v251_v9 = vmul.f32 %v1153_v46, %v239_v45  ;;  %v301_v53 = vpop.permute.xlu2 %300 }
  0xda   :  { %v310_v54 = vmul.f32 %v1147_v44, %v301_v53 }
  0xdb   :  { %v255_v56 = vadd.f32 1.0, %v251_v9 }
  0xdc   :  { %v314_v32 = vadd.f32 1.0, %v310_v54  ;;  %v102_v0 = vpop.permute.xlu0 %101 }
  0xdd   :  { %v259_v12 = vmul.f32 %v255_v56, %v1119_v57  ;;  %v108_v8 = vmul.f32 %v1058_v34, %v102_v0  ;;  %850 = vset.pattern.permute.xlu2 %v907_v2  ;;  %v170_v57 = vadd.f32 1.0, %v166_v1 }
  0xde   :  { %v318_v4 = vmul.f32 %v314_v32, %v260_v25  ;;  %849 = vset.pattern.permute.xlu1 %v908_v3  ;;  %507 = vperm.xlu2 %850, %v1051_v31   ;;  %v286_v3 = vadd.f32 1.0, %v282_v50  ;;  %v1233_v32 = vperm.slane %v1141_v33, 4 }
  0xdf   :  { %v112_v61 = vadd.f32 1.0, %v108_v8  ;;  %500 = vperm.xlu1 %849, %v1051_v31  }
  0xe0   :  { %v1207_v7 = vmul.f32 %v372_v60, %v318_v4 }
  0xe1   :  { %v116_v48 = vmul.f32 %v112_v61, %v62_v47  ;;  %v264_v34 = vpop.permute.xlu1 %263 }
  0xe2   :  { %v279_v2 = vmul.f32 %v1172_v40, %v264_v34  ;;  %v322_v58 = vpop.permute.xlu2 %321 }
  0xe3   :  { %v174_v25 = vmul.f32 %v170_v57, %v116_v48  ;;  %v337_v14 = vmul.f32 %v1165_v5, %v322_v58 }
  0xe4   :  { %v283_v26 = vadd.f32 1.0, %v279_v2  ;;  %v1214_v62 = vpop.permute.xlu0 %514 }
  0xe5   :  { %v341_v59 = vadd.f32 1.0, %v337_v14  ;;  %v232_v27 = vmul.f32 %v228_v10, %v174_v25  ;;  %v926_v14 = vmov 16  }
  0xe6   :  { %v287_v28 = vmul.f32 %v283_v26, %v229_v39  ;;  %853 = vset.pattern.permute.xlu2 %v910_v15 }
  0xe7   :  { %852 = vset.pattern.permute.xlu1 %v911_v16  ;;  %530 = vperm.xlu2 %853, %v1051_v31   ;;  %v290_v11 = vmul.f32 %v286_v3, %v232_v27 }
  0xe8   :  { %v345_v29 = vmul.f32 %v341_v59, %v287_v28  ;;  %522 = vperm.xlu1 %852, %v1051_v31  }
  0xe9   :  { %v272_v36 = vpop.permute.xlu1 %271 }
  0xea   :  { %v281_v13 = vmul.f32 %v1172_v40, %v272_v36  ;;  %v334_v41 = vpop.permute.xlu2 %333  ;;  %v927_v36 = vmov 19  }
  0xeb   :  { %v340_v49 = vmul.f32 %v1165_v5, %v334_v41 }
  0xec   :  { %v285_v38 = vadd.f32 1.0, %v281_v13  ;;  %v1265_v13 = vperm.slane %v1141_v33, 6 }
  0xed   :  { %v344_v39 = vadd.f32 1.0, %v340_v49  ;;  %v247_v16 = vpop.permute.xlu0 %246 }
  0xee   :  { %v289_v15 = vmul.f32 %v285_v38, %v1134_v51  ;;  %v253_v55 = vmul.f32 %v1153_v46, %v247_v16 }
  0xef   :  { %v1220_v45 = vmul.f32 %v344_v39, %v290_v11  ;;  %855 = vset.pattern.permute.xlu2 %v913_v18 }
  0xf0   :  { %854 = vset.pattern.permute.xlu1 %v912_v17  ;;  %546 = vperm.xlu2 %855, %v1051_v31   ;;  %v257_v18 = vadd.f32 1.0, %v253_v55  ;;  %v930_v55 = vmov 20  }
  0xf1   :  { %538 = vperm.xlu1 %854, %v1051_v31  }
  0xf2   :  { %v297_v9 = vpop.permute.xlu1 %296  ;;  %v261_v8 = vmul.f32 %v257_v18, %v1130_v23 }
  0xf3   :  { %v309_v40 = vmul.f32 %v1147_v44, %v297_v9  ;;  %v355_v53 = vpop.permute.xlu2 %354 }
  0xf4   :  { %v367_v54 = vmul.f32 %v1188_v52, %v355_v53  ;;  %v929_v53 = vmov 21  }
  0xf5   :  { %v313_v51 = vadd.f32 1.0, %v309_v40  ;;  %v453_v40 = vmul.f32 %v1265_v13, %v1177_v6 }
  0xf6   :  { %v371_v56 = vadd.f32 1.0, %v367_v54  ;;  %v1277_v54 = vperm.slane %v1141_v33, 7 }
  0xf7   :  { %v317_v60 = vmul.f32 %v313_v51, %v259_v12  ;;  %v457_v18 = vadd.f32 1.0, %v453_v40 }
  0xf8   :  { %858 = vset.pattern.permute.xlu2 %v914_v19 }
  0xf9   :  { %v375_v17 = vmul.f32 %v371_v56, %v317_v60  ;;  %857 = vset.pattern.permute.xlu1 %v920_v30  ;;  %570 = vperm.xlu2 %858, %v1051_v31  }
  0xfa   :  { %562 = vperm.xlu1 %857, %v1051_v31   ;;  %v305_v0 = vpop.permute.xlu1 %304 }
  0xfb   :  { %v311_v1 = vmul.f32 %v1147_v44, %v305_v0  ;;  %v931_v0 = vmov 31  }
  0xfc   :  { %v380_v46 = vpop.permute.xlu2 %379  ;;  %880 = vset.pattern.permute.xlu0 %v931_v0 }
  0xfd   :  { %v315_v12 = vadd.f32 1.0, %v311_v1  ;;  %v395_v19 = vmul.f32 %v1233_v32, %v380_v46 }
  0xff   :  { %v319_v4 = vmul.f32 %v315_v12, %v261_v8  ;;  %v399_v47 = vadd.f32 1.0, %v395_v19  ;;  %v932_v19 = vmov 24  }
 0x101   :  { %v1239_v35 = vmul.f32 %v399_v47, %v345_v29  ;;  %860 = vset.pattern.permute.xlu2 %v916_v21  ;;  %v1249_v21 = vperm.slane %v1141_v33, 5  ;;  %v1283_v33 = vpop.permute.xlu0 %554 }
 0x102   :  { %859 = vset.pattern.permute.xlu1 %v915_v20  ;;  %586 = vperm.xlu2 %860, %v1051_v31  }
 0x103   :  { %578 = vperm.xlu1 %859, %v1051_v31   ;;  %v330_v30 = vpop.permute.xlu1 %329  ;;  %v461_v46 = vmul.f32 %v457_v18, %v1239_v35 }
 0x104   :  { %v339_v44 = vmul.f32 %v1165_v5, %v330_v30  ;;  %v388_v50 = vpop.permute.xlu2 %387  ;;  %v933_v30 = vmov 23  }
 0x105   :  { %v397_v23 = vmul.f32 %v1233_v32, %v388_v50 }
 0x106   :  { %v343_v61 = vadd.f32 1.0, %v339_v44 }
 0x107   :  { %v401_v57 = vadd.f32 1.0, %v397_v23 }
 0x108   :  { %v347_v48 = vmul.f32 %v343_v61, %v289_v15 }
 0x10a   :  { %v405_v34 = vmul.f32 %v401_v57, %v347_v48  ;;  %862 = vset.pattern.permute.xlu2 %v917_v22  ;;  %v483_v57 = vmul.f32 %v1277_v54, %v1185_v37 }
 0x10b   :  { %861 = vset.pattern.permute.xlu1 %v924_v43  ;;  %610 = vperm.xlu2 %862, %v1051_v31  }
 0x10c   :  { %602 = vperm.xlu1 %861, %v1051_v31   ;;  %v351_v20 = vpop.permute.xlu1 %350 }
 0x10d   :  { %v366_v5 = vmul.f32 %v1188_v52, %v351_v20  ;;  %v413_v2 = vpop.permute.xlu2 %412 }
 0x10e   :  { %v425_v58 = vmul.f32 %v1249_v21, %v413_v2  ;;  %v487_v2 = vadd.f32 1.0, %v483_v57 }
 0x10f   :  { %v370_v10 = vadd.f32 1.0, %v366_v5 }
 0x110   :  { %v429_v3 = vadd.f32 1.0, %v425_v58 }
 0x111   :  { %v374_v25 = vmul.f32 %v370_v10, %v1160_v63  ;;  %v935_v10 = vmov 25  }
 0x112   :  { %v1257_v22 = vmul.f32 %v429_v3, %v375_v17 }
 0x113   :  { %864 = vset.pattern.permute.xlu2 %v926_v14 }
 0x114   :  { %863 = vset.pattern.permute.xlu1 %v919_v24  ;;  %v363_v43 = vpop.permute.xlu1 %362  ;;  %626 = vperm.xlu2 %864, %v1051_v31   ;;  %v928_v24 = vmov 18   ;;  %v491_v14 = vmul.f32 %v487_v2, %v1257_v22 }
 0x115   :  { %v369_v26 = vmul.f32 %v1188_v52, %v363_v43  ;;  %618 = vperm.xlu1 %863, %v1051_v31   ;;  %v421_v59 = vpop.permute.xlu2 %420 }
 0x116   :  { %v427_v27 = vmul.f32 %v1249_v21, %v421_v59 }
 0x117   :  { %v373_v28 = vadd.f32 1.0, %v369_v26 }
 0x118   :  { %v431_v11 = vadd.f32 1.0, %v427_v27 }
 0x119   :  { %v377_v29 = vmul.f32 %v373_v28, %v319_v4 }
 0x11b   :  { %v435_v63 = vmul.f32 %v431_v11, %v377_v29  ;;  %v936_v11 = vmov 29   ;;  %v937_v29 = vmov 28  }
 0x11c   :  { %867 = vset.pattern.permute.xlu2 %v927_v36 }
 0x11d   :  { %866 = vset.pattern.permute.xlu1 %v928_v24  ;;  %v384_v41 = vpop.permute.xlu1 %383  ;;  %650 = vperm.xlu2 %867, %v1051_v31  }
 0x11e   :  { %v396_v52 = vmul.f32 %v1233_v32, %v384_v41  ;;  %642 = vperm.xlu1 %866, %v1051_v31   ;;  %v446_v49 = vpop.permute.xlu2 %445 }
 0x11f   :  { %v455_v38 = vmul.f32 %v1265_v13, %v446_v49 }
 0x120   :  { %v400_v39 = vadd.f32 1.0, %v396_v52 }
 0x121   :  { %v459_v15 = vadd.f32 1.0, %v455_v38 }
 0x122   :  { %v404_v16 = vmul.f32 %v400_v39, %v1183_v42 }
 0x123   :  { %v1272_v9 = vmul.f32 %v459_v15, %v405_v34  ;;  %v392_v34 = vpop.permute.xlu0 %391 }
 0x124   :  { %v398_v37 = vmul.f32 %v1233_v32, %v392_v34 }
 0x125   :  { %869 = vset.pattern.permute.xlu2 %v929_v53 }
 0x126   :  { %868 = vset.pattern.permute.xlu1 %v930_v55  ;;  %v409_v51 = vpop.permute.xlu1 %408  ;;  %666 = vperm.xlu2 %869, %v1051_v31   ;;  %v402_v26 = vadd.f32 1.0, %v398_v37 }
 0x127   :  { %v424_v56 = vmul.f32 %v1249_v21, %v409_v51  ;;  %658 = vperm.xlu1 %868, %v1051_v31   ;;  %v467_v42 = vpop.permute.xlu2 %466 }
 0x128   :  { %v482_v60 = vmul.f32 %v1277_v54, %v467_v42  ;;  %v406_v36 = vmul.f32 %v402_v26, %v1220_v45 }
 0x129   :  { %v428_v17 = vadd.f32 1.0, %v424_v56 }
 0x12a   :  { %v486_v6 = vadd.f32 1.0, %v482_v60 }
 0x12b   :  { %v432_v1 = vmul.f32 %v428_v17, %v374_v25 }
 0x12d   :  { %v490_v8 = vmul.f32 %v486_v6, %v432_v1 }
 0x12e   :  { %v417_v12 = vpop.permute.xlu1 %416  ;;  %872 = vset.pattern.permute.xlu2 %v932_v19 }
 0x12f   :  { %v1286_v4 = vmul.f32 %v490_v8, %v461_v46  ;;  %v426_v47 = vmul.f32 %v1249_v21, %v417_v12  ;;  %871 = vset.pattern.permute.xlu1 %v933_v30  ;;  %690 = vperm.xlu2 %872, %v1051_v31   ;;  %v479_v44 = vpop.permute.xlu2 %478  ;;  %v934_v21 = vmov 26  }
 0x130   :  { %v485_v50 = vmul.f32 %v1277_v54, %v479_v44  ;;  %682 = vperm.xlu1 %871, %v1051_v31  }
 0x131   :  { %v430_v23 = vadd.f32 1.0, %v426_v47  ;;  %v510_v5 = vperm.slane %v1286_v4, 1  ;;  %v517_v45 = vperm.slane %v1286_v4, 2  ;;  %v503_v40 = vperm.slane %v1286_v4, 0 }
 0x132   :  { %v489_v61 = vadd.f32 1.0, %v485_v50  ;;  %v549_v51 = vperm.slane %v1286_v4, 6  ;;  %v525_v1 = vperm.slane %v1286_v4, 3  ;;  %v557_v44 = vperm.slane %v1286_v4, 7 }
 0x133   :  { %v434_v35 = vmul.f32 %v430_v23, %v1207_v7  ;;  %v518_v53 = vmul.f32 %v517_v45, %v1214_v62  ;;  %v541_v50 = vperm.slane %v1286_v4, 5 }
 0x134   :  { %v493_v48 = vmul.f32 %v489_v61, %v435_v63  ;;  %v558_v57 = vmul.f32 %v557_v44, %v1283_v33 }
 0x135   :  { %v519_v18 = vsub.f32 1.0, %v518_v53 }
 0x137   :  { %v442_v20 = vpop.permute.xlu1 %441  ;;  %874 = vset.pattern.permute.xlu2 %v934_v21 }
 0x138   :  { %v454_v58 = vmul.f32 %v1265_v13, %v442_v20  ;;  %873 = vset.pattern.permute.xlu1 %v935_v10  ;;  %706 = vperm.xlu2 %874, %v1051_v31   ;;  %v508_v3 = vpop.permute.xlu2 %507 }
 0x139   :  { %v511_v25 = vmul.f32 %v510_v5, %v508_v3  ;;  %698 = vperm.xlu1 %873, %v1051_v31  }
 0x13a   :  { %v458_v7 = vadd.f32 1.0, %v454_v58  ;;  %v559_v58 = vsub.f32 1.0, %v558_v57 }
 0x13b   :  { %v512_v19 = vsub.f32 1.0, %v511_v25 }
 0x13c   :  { %v462_v43 = vmul.f32 %v458_v7, %v404_v16  ;;  %v533_v16 = vperm.slane %v1286_v4, 4 }
 0x13e   :  { %v1301_v59 = vmul.f32 %v491_v14, %v462_v43 }
 0x13f   :  { %v450_v27 = vpop.permute.xlu1 %449 }
 0x140   :  { %v456_v28 = vmul.f32 %v1265_v13, %v450_v27  ;;  %877 = vset.pattern.permute.xlu2 %v936_v11  ;;  %v938_v13 = vmov 30   ;;  %v573_v61 = vperm.slane %v1301_v59, 1  ;;  %v589_v34 = vperm.slane %v1301_v59, 3 }
 0x141   :  { %876 = vset.pattern.permute.xlu1 %v937_v29  ;;  %730 = vperm.xlu2 %877, %v1051_v31   ;;  %v531_v63 = vpop.permute.xlu2 %530  ;;  %v565_v25 = vperm.slane %v1301_v59, 0  ;;  %v581_v11 = vperm.slane %v1301_v59, 2  ;;  %v595_v29 = vpop.permute.xlu0 %594  ;;  %v605_v53 = vperm.slane %v1301_v59, 5 }
 0x142   :  { %v460_v32 = vadd.f32 1.0, %v456_v28  ;;  %722 = vperm.xlu1 %876, %v1051_v31   ;;  %v534_v55 = vmul.f32 %v533_v16, %v531_v63  ;;  %v597_v28 = vperm.slane %v1301_v59, 4 }
 0x144   :  { %v464_v22 = vmul.f32 %v460_v32, %v406_v36  ;;  %v535_v17 = vsub.f32 1.0, %v534_v55  ;;  %v613_v36 = vperm.slane %v1301_v59, 6 }
 0x146   :  { %v1307_v24 = vmul.f32 %v493_v48, %v464_v22  ;;  %v598_v22 = vmul.f32 %v597_v28, %v595_v29 }
 0x148   :  { %v475_v41 = vpop.permute.xlu1 %474  ;;  %v599_v45 = vsub.f32 1.0, %v598_v22 }
 0x149   :  { %v484_v52 = vmul.f32 %v1277_v54, %v475_v41  ;;  %879 = vset.pattern.permute.xlu2 %v931_v0 }
 0x14a   :  { %878 = vset.pattern.permute.xlu1 %v938_v13  ;;  %746 = vperm.xlu2 %879, %v1051_v31   ;;  %v547_v49 = vpop.permute.xlu2 %546 }
 0x14b   :  { %v488_v38 = vadd.f32 1.0, %v484_v52  ;;  %738 = vperm.xlu1 %878, %v1051_v31   ;;  %v550_v60 = vmul.f32 %v549_v51, %v547_v49 }
 0x14d   :  { %v492_v39 = vmul.f32 %v488_v38, %v434_v35  ;;  %v551_v0 = vsub.f32 1.0, %v550_v60 }
 0x14f   :  { %v1314_v15 = vmul.f32 %v492_v39, %v1272_v9 }
 0x151   :  { %v501_v54 = vpop.permute.xlu1 %500  ;;  %v629_v52 = vperm.slane %v1314_v15, 0 }
 0x152   :  { %v504_v56 = vmul.f32 %v503_v40, %v501_v54 }
 0x153   :  { %v571_v42 = vpop.permute.xlu2 %570 }
 0x154   :  { %v505_v31 = vsub.f32 1.0, %v504_v56  ;;  %v574_v48 = vmul.f32 %v573_v61, %v571_v42 }
 0x156   :  { %v520_v6 = vmul.f32 %v519_v18, %v505_v31  ;;  %v575_v10 = vsub.f32 1.0, %v574_v48  ;;  %v637_v18 = vperm.slane %v1314_v15, 1 }
 0x158   :  { %v536_v9 = vmul.f32 %v535_v17, %v520_v6  ;;  %v621_v6 = vperm.slane %v1301_v59, 7 }
 0x15a   :  { %v523_v46 = vpop.permute.xlu1 %522  ;;  %v552_v8 = vmul.f32 %v551_v0, %v536_v9  ;;  %v635_v0 = vpop.permute.xlu0 %634 }
 0x15b   :  { %v526_v12 = vmul.f32 %v525_v1, %v523_v46  ;;  %v653_v1 = vperm.slane %v1314_v15, 3 }
 0x15c   :  { %v587_v47 = vpop.permute.xlu2 %586 }
 0x15d   :  { %v527_v62 = vsub.f32 1.0, %v526_v12  ;;  %v590_v5 = vmul.f32 %v589_v34, %v587_v47 }
 0x15f   :  { %v528_v30 = vmul.f32 %v527_v62, %v512_v19  ;;  %v591_v37 = vsub.f32 1.0, %v590_v5  ;;  %v669_v19 = vperm.slane %v1314_v15, 5 }
 0x163   :  { %v539_v23 = vpop.permute.xlu1 %538 }
 0x164   :  { %v542_v35 = vmul.f32 %v541_v50, %v539_v23 }
 0x165   :  { %v611_v21 = vpop.permute.xlu2 %610 }
 0x166   :  { %v543_v20 = vsub.f32 1.0, %v542_v35  ;;  %v614_v41 = vmul.f32 %v613_v36, %v611_v21  ;;  %v645_v35 = vperm.slane %v1314_v15, 2 }
 0x168   :  { %v544_v2 = vmul.f32 %v543_v20, %v528_v30  ;;  %v615_v16 = vsub.f32 1.0, %v614_v41 }
 0x16a   :  { %v560_v3 = vmul.f32 %v559_v58, %v544_v2  ;;  %v677_v2 = vperm.slane %v1314_v15, 6  ;;  %v675_v58 = vpop.permute.xlu0 %674 }
 0x16c   :  { %v563_v4 = vpop.permute.xlu1 %562  ;;  %v576_v7 = vmul.f32 %v575_v10, %v560_v3  ;;  %v661_v10 = vperm.slane %v1314_v15, 4 }
 0x16d   :  { %v566_v14 = vmul.f32 %v565_v25, %v563_v4 }
 0x16e   :  { %v592_v43 = vmul.f32 %v591_v37, %v576_v7  ;;  %v627_v33 = vpop.permute.xlu2 %626  ;;  %v693_v37 = vperm.slane %v1307_v24, 0  ;;  %v678_v7 = vmul.f32 %v677_v2, %v675_v58 }
 0x16f   :  { %v567_v26 = vsub.f32 1.0, %v566_v14  ;;  %v630_v49 = vmul.f32 %v629_v52, %v627_v33 }
 0x170   :  { %v679_v28 = vsub.f32 1.0, %v678_v7 }
 0x171   :  { %v568_v27 = vmul.f32 %v567_v26, %v552_v8  ;;  %v631_v54 = vsub.f32 1.0, %v630_v49  ;;  %v638_v8 = vmul.f32 %v637_v18, %v635_v0  ;;  %v725_v0 = vperm.slane %v1307_v24, 4 }
 0x173   :  { %v639_v44 = vsub.f32 1.0, %v638_v8 }
 0x175   :  { %v579_v63 = vpop.permute.xlu1 %578 }
 0x176   :  { %v582_v32 = vmul.f32 %v581_v11, %v579_v63  ;;  %v685_v63 = vperm.slane %v1314_v15, 7 }
 0x177   :  { %v651_v39 = vpop.permute.xlu2 %650 }
 0x178   :  { %v583_v13 = vsub.f32 1.0, %v582_v32  ;;  %v654_v12 = vmul.f32 %v653_v1, %v651_v39  ;;  %v715_v39 = vpop.permute.xlu0 %714 }
 0x17a   :  { %v584_v38 = vmul.f32 %v583_v13, %v568_v27  ;;  %v655_v50 = vsub.f32 1.0, %v654_v12 }
 0x17c   :  { %v600_v40 = vmul.f32 %v599_v45, %v584_v38  ;;  %v717_v45 = vperm.slane %v1307_v24, 3 }
 0x17e   :  { %v603_v55 = vpop.permute.xlu1 %602  ;;  %v616_v51 = vmul.f32 %v615_v16, %v600_v40  ;;  %v701_v16 = vperm.slane %v1307_v24, 1 }
 0x17f   :  { %v606_v56 = vmul.f32 %v605_v53, %v603_v55  ;;  %v718_v53 = vmul.f32 %v717_v45, %v715_v39 }
 0x180   :  { %v632_v42 = vmul.f32 %v631_v54, %v616_v51  ;;  %v667_v17 = vpop.permute.xlu2 %666  ;;  %v733_v54 = vperm.slane %v1307_v24, 5 }
 0x181   :  { %v607_v60 = vsub.f32 1.0, %v606_v56  ;;  %v670_v47 = vmul.f32 %v669_v19, %v667_v17  ;;  %v749_v56 = vperm.slane %v1307_v24, 7 }
 0x183   :  { %v608_v31 = vmul.f32 %v607_v60, %v592_v43  ;;  %v671_v57 = vsub.f32 1.0, %v670_v47  ;;  %v709_v43 = vperm.slane %v1307_v24, 2  ;;  %v719_v60 = vsub.f32 1.0, %v718_v53 }
 0x184   :  { %v741_v47 = vperm.slane %v1307_v24, 6 }
 0x187   :  { %v619_v9 = vpop.permute.xlu1 %618 }
 0x188   :  { %v622_v46 = vmul.f32 %v621_v6, %v619_v9 }
 0x189   :  { %v691_v61 = vpop.permute.xlu2 %690 }
 0x18a   :  { %v623_v62 = vsub.f32 1.0, %v622_v46  ;;  %v694_v14 = vmul.f32 %v693_v37, %v691_v61 }
 0x18c   :  { %v624_v30 = vmul.f32 %v623_v62, %v608_v31  ;;  %v695_v11 = vsub.f32 1.0, %v694_v14 }
 0x18e   :  { %v640_v23 = vmul.f32 %v639_v44, %v624_v30 }
 0x190   :  { %v643_v59 = vpop.permute.xlu1 %642  ;;  %v656_v48 = vmul.f32 %v655_v50, %v640_v23 }
 0x191   :  { %v646_v34 = vmul.f32 %v645_v35, %v643_v59 }
 0x192   :  { %v672_v20 = vmul.f32 %v671_v57, %v656_v48  ;;  %v707_v3 = vpop.permute.xlu2 %706 }
 0x193   :  { %v647_v21 = vsub.f32 1.0, %v646_v34  ;;  %v710_v27 = vmul.f32 %v709_v43, %v707_v3 }
 0x195   :  { %v648_v5 = vmul.f32 %v647_v21, %v632_v42  ;;  %v711_v36 = vsub.f32 1.0, %v710_v27 }
 0x199   :  { %v659_v25 = vpop.permute.xlu1 %658 }
 0x19a   :  { %v662_v4 = vmul.f32 %v661_v10, %v659_v25 }
 0x19b   :  { %v731_v41 = vpop.permute.xlu2 %730 }
 0x19c   :  { %v663_v26 = vsub.f32 1.0, %v662_v4  ;;  %v734_v15 = vmul.f32 %v733_v54, %v731_v41 }
 0x19e   :  { %v664_v33 = vmul.f32 %v663_v26, %v648_v5  ;;  %v735_v17 = vsub.f32 1.0, %v734_v15 }
 0x1a0   :  { %v680_v29 = vmul.f32 %v679_v28, %v664_v33 }
 0x1a2   :  { %v683_v32 = vpop.permute.xlu1 %682  ;;  %v696_v22 = vmul.f32 %v695_v11, %v680_v29 }
 0x1a3   :  { %v686_v52 = vmul.f32 %v685_v63, %v683_v32 }
 0x1a4   :  { %v712_v13 = vmul.f32 %v711_v36, %v696_v22  ;;  %v747_v51 = vpop.permute.xlu2 %746 }
 0x1a5   :  { %v687_v49 = vsub.f32 1.0, %v686_v52  ;;  %v750_v31 = vmul.f32 %v749_v56, %v747_v51 }
 0x1a7   :  { %v688_v38 = vmul.f32 %v687_v49, %v672_v20  ;;  %v751_v9 = vsub.f32 1.0, %v750_v31 }
 0x1ab   :  { %v699_v40 = vpop.permute.xlu1 %698 }
 0x1ac   :  { %v702_v55 = vmul.f32 %v701_v16, %v699_v40 }
 0x1ae   :  { %v703_v42 = vsub.f32 1.0, %v702_v55 }
 0x1b0   :  { %v704_v18 = vmul.f32 %v703_v42, %v688_v38 }
 0x1b2   :  { %v720_v6 = vmul.f32 %v719_v60, %v704_v18 }
 0x1b4   :  { %v736_v1 = vmul.f32 %v735_v17, %v720_v6  ;;  %v723_v46 = vpop.permute.xlu1 %722 }
 0x1b5   :  { %v726_v8 = vmul.f32 %v725_v0, %v723_v46 }
 0x1b6   :  { %v752_v12 = vmul.f32 %v751_v9, %v736_v1 }
 0x1b7   :  { %v727_v19 = vsub.f32 1.0, %v726_v8 }
 0x1b9   :  { %v728_v62 = vmul.f32 %v727_v19, %v712_v13 }
 0x1bd   :  { %v739_v30 = vpop.permute.xlu1 %738 }
 0x1be   :  { %v742_v44 = vmul.f32 %v741_v47, %v739_v30 }
 0x1c0   :  { %v743_v50 = vsub.f32 1.0, %v742_v44 }
 0x1c2   :  { %v744_v23 = vmul.f32 %v743_v50, %v728_v62 }
 0x1c4   :  { %v753_v61 = vmul.f32 %v752_v12, %v744_v23 }
 0x1c6   :  { %v754_v35 = vsub.f32 1.0, %v753_v61 }
 0x1c8   :  { %755 = vst [vmem:[#allocation2] sm:$0xff] %v754_v35 }
 0x1c9   :  { %766 = dma.vmem_to_hbm [thread:$0]  %s762_s24, 128, %s764_s27, [#allocation3]  }
 0x1ca   :  { %905 = dma.done.wait [#allocation3], 128  }
 0x1cb   :  { %906 = vsyncadd [#allocation3], 4294967168 }
 0x1cc   :  { %771 = vsyncpa [#allocation3], 1 }

</bundles_post_ra>
